<compile_context>
chip_gen: v7x
topology: tpu7x:2x2x1
jax: 0.10.0
libtpu: 0.0.40
codegen_flags: <defaults>
</compile_context>

<pallas_src>
import math
from functools import partial

import jax
import jax.numpy as jnp
from jax import lax
from jax.experimental import pallas as pl
from jax.experimental.pallas import tpu as pltpu

# ----------------------------- configuration --------------------------------
BATCH = 2               # batch_count (conditional + unconditional stream)
TEXT_LEN = 8            # text / encoder sequence length
EMBED = 32              # embed_count
HEADS = 4               # attention_head_count  (head_dim = 8)
HEAD_DIM = EMBED // HEADS
GLU_EMBED = 64          # glu_embed_count
IMG_TOKENS = 16         # image_token_count (self-attn KV cache length)
VOCAB = 128             # image_vocab_size + 1
LAYERS = 2              # layer_count
SAMPLE_TOKENS = 4       # sample_token_count
START_TOKEN = 0
CONDITION_FACTOR = 10.0
TOPK = 50

BE = BATCH * EMBED             # 64 packed lanes per K (and per V)
BH = BATCH * HEADS             # 8 packed score columns
KV_WIDTH = 2 * BE              # 128 lanes: [K_b0 | K_b1 | V_b0 | V_b1] per timestep
WDTYPE = jnp.bfloat16          # streamed matmul weight dtype (int8/fp8 at real sizes)
KV_DTYPE = jnp.bfloat16        # KV cache / cross-KV storage dtype
NEG_INF = -1e12


def _ln(x, g, b, eps=1e-5):
    """LayerNorm over the last axis (torch semantics: biased var, eps in sqrt)."""
    mu = jnp.mean(x, axis=-1, keepdims=True)
    var = jnp.mean((x - mu) ** 2, axis=-1, keepdims=True)
    return (x - mu) * jax.lax.rsqrt(var + eps) * g + b


# --------------------- fused decoder-stack kernel (grid over layers) ---------
def _decoder_stack_kernel(
        # per-layer inputs (leading LAYERS dim blocked by the grid, double-buffered)
        ln_ref,                # (10, E)   5 x (gamma, beta)
        glu_ln1_ref,           # (2, GLU)
        qkv_w_ref,             # (E, 3E)   bf16 fused q|k|v
        self_out_w_ref,        # (E, E)    bf16
        cross_q_w_ref,         # (E, E)    bf16
        cross_out_w_ref,       # (E, E)    bf16
        glu_w01_ref,           # (E, 2*GLU) bf16 fused fc0|fc1
        glu_w2_ref,            # (GLU, E)  bf16
        cross_kv_ref,          # (T_text, 2*B*E) bf16 precomputed encoder K|V (packed)
        state_ref,             # (T_img, 2*B*E)  bf16 self-attn KV cache (packed)
        # grid-constant inputs (block index never changes -> loaded once)
        dec_in_ref,            # (B, E) f32  embedded prev token (post ln_emb)
        self_bias_ref,         # (T_img, B*H) f32  causal additive bias (per step)
        tok_sel_ref,           # (T_img, 1)  f32  one-hot at current token row
        text_bias_ref,         # (T_text, B*H) f32 cross-attn mask bias
        p_blk_ref,             # (B*E, B*H) bf16 block-diag head pooling
        sel_ref,               # (B*H, B*E) f32  batch/head selection mask
        final_ln_ref,          # (2, E) f32
        lm_w_ref,              # (E, VOCAB) bf16
        # outputs
        kv_new_ref,            # (1, 2*B*E)  lane-dense new KV row for this layer
        logits_ref,            # (1, VOCAB)  CF-mixed logits (written at last layer)
        # scratch
        dec_ref,               # VMEM (B, E) f32  decoder state carried across layers
        *, head_count, condition_factor):
    layer = pl.program_id(0)
    B, E = dec_in_ref.shape
    be = B * E
    inv_sqrt_hd = 1.0 / math.sqrt(E // head_count)

    @pl.when(layer == 0)
    def _():
        dec_ref[...] = dec_in_ref[...]

    def mm(x, w_ref):
        # bf16 MXU matmul with f32 accumulation.
        return jnp.dot(x.astype(jnp.bfloat16), w_ref[...],
                       preferred_element_type=jnp.float32)

    def pack(x):      # (B, E) -> (1, B*E) lane-packed  [b0 | b1]
        return jnp.concatenate([x[b:b + 1, :] for b in range(B)], axis=1)

    def unpack(x):    # (1, B*E) -> (B, E)
        return jnp.concatenate([x[:, b * E:(b + 1) * E] for b in range(B)], axis=0)

    p_blk = p_blk_ref[...]          # (BE, BH) bf16, exact 0/1
    sel = sel_ref[...]              # (BH, BE) f32,  exact 0/1

    def attend(q_pack, k_pack, v_pack, bias_bh):
        # q_pack (1,BE) bf16 pre-scaled; k_pack/v_pack (T,BE) bf16; bias (T,BH) f32.
        prod = k_pack * q_pack                                                # (T, BE)
        scores = jnp.dot(prod, p_blk,
                         preferred_element_type=jnp.float32) + bias_bh        # (T, BH)
        m = jnp.max(scores, axis=0, keepdims=True)
        ex = jnp.exp(scores - m)
        w = ex * pl.reciprocal(jnp.sum(ex, axis=0, keepdims=True), approx=True)
        # Contract over T on the MXU (TN dim numbers), then reduce over only B*H rows.
        ctx = lax.dot_general(w.astype(jnp.bfloat16), v_pack,
                              (((0,), (0,)), ((), ())),
                              preferred_element_type=jnp.float32)             # (BH, BE)
        return unpack(jnp.sum(ctx * sel, axis=0, keepdims=True))              # (B, E)

    dec = dec_ref[...]

    # ----------------------- self attention (with KV cache) ------------------
    residual = dec
    x = _ln(dec, ln_ref[0:1], ln_ref[1:2])
    qkv = mm(x, qkv_w_ref)                                                    # (B, 3E)
    q_pack = (pack(qkv[:, :E]) * inv_sqrt_hd).astype(jnp.bfloat16)
    k_row = pack(qkv[:, E:2 * E]).astype(jnp.bfloat16)                        # (1, BE)
    v_row = pack(qkv[:, 2 * E:]).astype(jnp.bfloat16)                         # (1, BE)
    kv_row = jnp.concatenate([k_row, v_row], axis=1)                          # (1, 2BE)
    kv_new_ref[...] = kv_row          # single lane-dense 128-wide unmasked store

    use_new = tok_sel_ref[...] != 0.0                                         # (T, 1)
    kv_eff = jnp.where(use_new, kv_row, state_ref[...])                       # (T, 2BE)
    attn = attend(q_pack, kv_eff[:, :be], kv_eff[:, be:], self_bias_ref[...])
    attn = mm(attn, self_out_w_ref)
    dec = residual + _ln(attn, ln_ref[2:3], ln_ref[3:4])

    # ----------------------- cross attention (K/V precomputed) ---------------
    residual = dec
    x = _ln(dec, ln_ref[4:5], ln_ref[5:6])
    q_pack = (pack(mm(x, cross_q_w_ref)) * inv_sqrt_hd).astype(jnp.bfloat16)
    attn = attend(q_pack, cross_kv_ref[:, :be], cross_kv_ref[:, be:],
                  text_bias_ref[...])
    attn = mm(attn, cross_out_w_ref)
    dec = residual + _ln(attn, ln_ref[6:7], ln_ref[7:8])

    # ----------------------- GLU feed-forward --------------------------------
    residual = dec
    z = _ln(dec, ln_ref[8:9], ln_ref[9:10])
    h = mm(z, glu_w01_ref)                                                    # (B, 2G)
    G = glu_ln1_ref.shape[1]
    gated = jax.nn.gelu(h[:, :G], approximate=True) * h[:, G:]                # tanh GELU (EUP)
    z = _ln(gated, glu_ln1_ref[0:1], glu_ln1_ref[1:2])
    dec = residual + mm(z, glu_w2_ref)

    dec_ref[...] = dec

    # ----------------------- final LN + LM head + classifier-free mix --------
    @pl.when(layer == pl.num_programs(0) - 1)
    def _():
        xf = _ln(dec, final_ln_ref[0:1], final_ln_ref[1:2])
        logits = mm(xf, lm_w_ref)                                             # (B, VOCAB)
        a = condition_factor
        logits_ref[...] = (1.0 - a) * logits[0:1] + a * logits[1:2]


# ------------------------------ pallas_call setup -----------------------------
def _stacked(*tail):
    nd = len(tail)
    return pl.BlockSpec((None,) + tail, lambda l: (l,) + (0,) * nd)


def _const(*shape):
    nd = len(shape)
    return pl.BlockSpec(shape, lambda l: (0,) * nd)


_DECODER_CALL = pl.pallas_call(
    partial(_decoder_stack_kernel, head_count=HEADS,
            condition_factor=CONDITION_FACTOR),
    out_shape=(jax.ShapeDtypeStruct((LAYERS, 1, KV_WIDTH), KV_DTYPE),
               jax.ShapeDtypeStruct((1, VOCAB), jnp.float32)),
    grid_spec=pltpu.PrefetchScalarGridSpec(
        num_scalar_prefetch=0,
        grid=(LAYERS,),
        in_specs=[
            _stacked(10, EMBED),                    # ln (5 gamma/beta pairs)
            _stacked(2, GLU_EMBED),                 # glu_ln1
            _stacked(EMBED, 3 * EMBED),             # fused qkv weight
            _stacked(EMBED, EMBED),                 # self out proj
            _stacked(EMBED, EMBED),                 # cross q proj
            _stacked(EMBED, EMBED),                 # cross out proj
            _stacked(EMBED, 2 * GLU_EMBED),         # fused glu fc0|fc1
            _stacked(GLU_EMBED, EMBED),             # glu fc2
            _stacked(TEXT_LEN, KV_WIDTH),           # precomputed cross K|V (packed bf16)
            _stacked(IMG_TOKENS, KV_WIDTH),         # self-attn KV cache (packed bf16)
            _const(BATCH, EMBED),                   # embedded prev token
            _const(IMG_TOKENS, BH),                 # causal self-attn bias
            _const(IMG_TOKENS, 1),                  # current-token one-hot
            _const(TEXT_LEN, BH),                   # text mask bias
            _const(BE, BH),                         # block-diag head pooling
            _const(BH, BE),                         # batch/head selection mask
            _const(2, EMBED),                       # final_ln
            _const(EMBED, VOCAB),                   # lm head weight
        ],
        out_specs=(
            pl.BlockSpec((None, 1, KV_WIDTH), lambda l: (l, 0, 0)),
            pl.BlockSpec((1, VOCAB), lambda l: (0, 0)),
        ),
        scratch_shapes=[pltpu.VMEM((BATCH, EMBED), jnp.float32)],
    ),
    compiler_params=pltpu.CompilerParams(dimension_semantics=("arbitrary",)),
)


# ------------------------------ parameters -----------------------------------
def init_params(key):
    ks = jax.random.split(key, 12)

    def nrm(k, shape, dtype=jnp.float32):
        return (0.02 * jax.random.normal(k, shape, dtype=jnp.float32)).astype(dtype)

    def ln_stacked(rows, width):
        arr = jnp.zeros((LAYERS, rows, width), jnp.float32)
        return arr.at[:, 0::2].set(1.0)       # even rows = gamma = 1, odd = beta = 0

    def ln_single(width):
        return jnp.stack([jnp.ones((width,), jnp.float32),
                          jnp.zeros((width,), jnp.float32)])

    return dict(
        embed_tokens=nrm(ks[0], (VOCAB, EMBED)),
        embed_positions=nrm(ks[1], (IMG_TOKENS, EMBED)),
        ln_emb=ln_single(EMBED),
        final_ln=ln_single(EMBED),
        lm_w=nrm(ks[2], (EMBED, VOCAB), WDTYPE),
        # per-layer, stacked along a leading LAYERS dim for the grid:
        ln=ln_stacked(10, EMBED),               # pre_self|self|pre_enc|enc|glu_ln0
        glu_ln1=ln_stacked(2, GLU_EMBED),
        qkv_w=nrm(ks[3], (LAYERS, EMBED, 3 * EMBED), WDTYPE),
        self_out_w=nrm(ks[4], (LAYERS, EMBED, EMBED), WDTYPE),
        cross_q_w=nrm(ks[5], (LAYERS, EMBED, EMBED), WDTYPE),
        cross_k_w=nrm(ks[6], (LAYERS, EMBED, EMBED)),              # f32: one-time precompute
        cross_v_w=nrm(ks[7], (LAYERS, EMBED, EMBED)),
        cross_out_w=nrm(ks[8], (LAYERS, EMBED, EMBED), WDTYPE),
        glu_w01=nrm(ks[9], (LAYERS, EMBED, 2 * GLU_EMBED), WDTYPE),
        glu_w2=nrm(ks[10], (LAYERS, GLU_EMBED, EMBED), WDTYPE),
    )


# ------------------------------ decode loop -----------------------------------
@jax.jit
def dalle_bart_decoder_forward(params, text_tokens, encoder_state, key):
    # ---- one-time precomputation (constant across all SAMPLE_TOKENS steps) ----
    # Cross-attention additive bias, repeated per head: (T_text, B*H).
    bias_tb = jnp.where(text_tokens != 1, 0.0, NEG_INF).astype(jnp.float32).T
    text_bias_bh = jnp.repeat(bias_tb, HEADS, axis=1)

    # Block-diagonal head-pooling / selection matrices (exact 0/1 values).
    head_of_e = jnp.arange(EMBED) // HEAD_DIM
    batch_eq = (jnp.arange(BATCH)[:, None, None, None]
                == jnp.arange(BATCH)[None, None, :, None])
    head_eq = (head_of_e[None, :, None, None]
               == jnp.arange(HEADS)[None, None, None, :])
    p_blk = (batch_eq & head_eq).reshape(BE, BH)       # [b*E+e, b'*H+h]
    sel = p_blk.T.astype(jnp.float32)                  # (BH, BE)
    p_blk = p_blk.astype(jnp.bfloat16)

    # Cross-attention K/V depend only on encoder_state: compute once, packed bf16.
    ck = jnp.einsum('bte,lef->ltbf', encoder_state, params['cross_k_w'])
    cv = jnp.einsum('bte,lef->ltbf', encoder_state, params['cross_v_w'])
    cross_kv = jnp.concatenate(
        [ck.reshape(LAYERS, TEXT_LEN, BE),
         cv.reshape(LAYERS, TEXT_LEN, BE)], axis=-1).astype(KV_DTYPE)   # (L, T, 128)

    attention_state = jnp.zeros((LAYERS, IMG_TOKENS, KV_WIDTH), KV_DTYPE)
    t_iota = jnp.arange(IMG_TOKENS)

    def step(carry, token_index):
        attention_state, prev_token, key = carry
        prev_b = jnp.broadcast_to(prev_token, (BATCH,))
        dec = (params['embed_tokens'][prev_b]
               + params['embed_positions'][token_index][None, :])
        dec = _ln(dec, params['ln_emb'][0:1], params['ln_emb'][1:2])

        # Per-step causal bias / current-token one-hot, hoisted out of the kernel.
        self_bias_bh = jnp.broadcast_to(
            jnp.where(t_iota <= token_index, 0.0, NEG_INF)[:, None],
            (IMG_TOKENS, BH)).astype(jnp.float32)
        tok_sel = (t_iota == token_index).astype(jnp.float32)[:, None]

        kv_rows, cf_logits = _DECODER_CALL(
            params['ln'], params['glu_ln1'], params['qkv_w'], params['self_out_w'],
            params['cross_q_w'], params['cross_out_w'], params['glu_w01'],
            params['glu_w2'], cross_kv, attention_state,
            dec, self_bias_bh, tok_sel, text_bias_bh, p_blk, sel,
            params['final_ln'], params['lm_w'])

        # Single-row lane-dense KV cache update on the (donated) scan carry.
        # TODO(synk): at production sizes write this row in place from the kernel
        # (pl.ANY cache + make_async_copy or input_output_aliases) and only DMA the
        # rows <= token_index of the cache per layer.
        attention_state = lax.dynamic_update_slice(
            attention_state, kv_rows, (jnp.int32(0), token_index, jnp.int32(0)))

        logits = cf_logits[0]
        # TODO(synk): top-k filtering + multinomial sampling have no clean Pallas
        # equivalent (no in-kernel sort/sample primitive); done in plain JAX.
        top = lax.top_k(logits, TOPK)[0]
        probs = jnp.where(logits < top[-1], 0.0, jnp.exp(logits - top[0]))
        key, sub = jax.random.split(key)
        next_token = jax.random.categorical(sub, jnp.log(probs)).astype(jnp.int32)
        return (attention_state, next_token, key), next_token

    init = (attention_state, jnp.asarray(START_TOKEN, jnp.int32), key)
    token_indices = jnp.arange(SAMPLE_TOKENS, dtype=jnp.int32)
    _, image_tokens = lax.scan(step, init, token_indices)
    return image_tokens


if __name__ == "__main__":
    root = jax.random.PRNGKey(0)
    pkey, tkey, ekey, skey = jax.random.split(root, 4)
    params = init_params(pkey)
    text_tokens = jax.random.randint(tkey, (BATCH, TEXT_LEN), 0, 6, dtype=jnp.int32)
    encoder_state = jax.random.normal(ekey, (BATCH, TEXT_LEN, EMBED), dtype=jnp.float32)

    image_tokens = dalle_bart_decoder_forward(params, text_tokens, encoder_state, skey)
    jax.block_until_ready(image_tokens)
    assert image_tokens.shape == (SAMPLE_TOKENS,)
    print("KERNEL_OK")
</pallas_src>

<mosaic_0001>
module attributes {stable_mosaic.version = 11 : i64} {
  func.func @_decoder_stack_kernel(%arg0: i32, %arg1: memref<1x10x32xf32, #tpu.memory_space<vmem>>, %arg2: memref<1x2x64xf32, #tpu.memory_space<vmem>>, %arg3: memref<1x32x96xbf16, #tpu.memory_space<vmem>>, %arg4: memref<1x32x32xbf16, #tpu.memory_space<vmem>>, %arg5: memref<1x32x32xbf16, #tpu.memory_space<vmem>>, %arg6: memref<1x32x32xbf16, #tpu.memory_space<vmem>>, %arg7: memref<1x32x128xbf16, #tpu.memory_space<vmem>>, %arg8: memref<1x64x32xbf16, #tpu.memory_space<vmem>>, %arg9: memref<1x8x128xbf16, #tpu.memory_space<vmem>>, %arg10: memref<1x16x128xbf16, #tpu.memory_space<vmem>>, %arg11: memref<2x32xf32, #tpu.memory_space<vmem>>, %arg12: memref<16x8xf32, #tpu.memory_space<vmem>>, %arg13: memref<16x1xf32, #tpu.memory_space<vmem>>, %arg14: memref<8x8xf32, #tpu.memory_space<vmem>>, %arg15: memref<64x8xbf16, #tpu.memory_space<vmem>>, %arg16: memref<8x64xf32, #tpu.memory_space<vmem>>, %arg17: memref<2x32xf32, #tpu.memory_space<vmem>>, %arg18: memref<32x128xbf16, #tpu.memory_space<vmem>>, %arg19: memref<1x1x128xbf16, #tpu.memory_space<vmem>>, %arg20: memref<1x128xf32, #tpu.memory_space<vmem>>, %arg21: memref<2x32xf32, #tpu.memory_space<vmem>>) attributes {dimension_semantics = [#tpu.dimension_semantics<arbitrary>], iteration_bounds = array<i64: 2>, scalar_prefetch = 0 : i64, scratch_operands = 1 : i64, tpu.core_type = #tpu.core_type<tc>, window_params = [{transform_indices = @transform_0, window_bounds = array<i64: 1, 10, 32>}, {transform_indices = @transform_1, window_bounds = array<i64: 1, 2, 64>}, {transform_indices = @transform_2, window_bounds = array<i64: 1, 32, 96>}, {transform_indices = @transform_3, window_bounds = array<i64: 1, 32, 32>}, {transform_indices = @transform_4, window_bounds = array<i64: 1, 32, 32>}, {transform_indices = @transform_5, window_bounds = array<i64: 1, 32, 32>}, {transform_indices = @transform_6, window_bounds = array<i64: 1, 32, 128>}, {transform_indices = @transform_7, window_bounds = array<i64: 1, 64, 32>}, {transform_indices = @transform_8, window_bounds = array<i64: 1, 8, 128>}, {transform_indices = @transform_9, window_bounds = array<i64: 1, 16, 128>}, {pipeline_mode = #tpu.pipeline_mode<synchronous>, transform_indices = @transform_10, window_bounds = array<i64: 2, 32>}, {pipeline_mode = #tpu.pipeline_mode<synchronous>, transform_indices = @transform_11, window_bounds = array<i64: 16, 8>}, {pipeline_mode = #tpu.pipeline_mode<synchronous>, transform_indices = @transform_12, window_bounds = array<i64: 16, 1>}, {pipeline_mode = #tpu.pipeline_mode<synchronous>, transform_indices = @transform_13, window_bounds = array<i64: 8, 8>}, {pipeline_mode = #tpu.pipeline_mode<synchronous>, transform_indices = @transform_14, window_bounds = array<i64: 64, 8>}, {pipeline_mode = #tpu.pipeline_mode<synchronous>, transform_indices = @transform_15, window_bounds = array<i64: 8, 64>}, {pipeline_mode = #tpu.pipeline_mode<synchronous>, transform_indices = @transform_16, window_bounds = array<i64: 2, 32>}, {pipeline_mode = #tpu.pipeline_mode<synchronous>, transform_indices = @transform_17, window_bounds = array<i64: 32, 128>}, {transform_indices = @transform_18, window_bounds = array<i64: 1, 1, 128>}, {pipeline_mode = #tpu.pipeline_mode<synchronous>, transform_indices = @transform_19, window_bounds = array<i64: 1, 128>}]} {
    %c0_i32 = arith.constant 0 : i32
    %0 = arith.cmpi eq, %arg0, %c0_i32 : i32
    %1 = arith.extui %0 : i1 to i32
    %c0_i32_0 = arith.constant 0 : i32
    %2 = arith.cmpi ne, %1, %c0_i32_0 : i32
    scf.if %2 {
      %c0_123 = arith.constant 0 : index
      %c0_124 = arith.constant 0 : index
      %298 = vector.load %arg11[%c0_123, %c0_124] : memref<2x32xf32, #tpu.memory_space<vmem>>, vector<2x32xf32>
      %c0_125 = arith.constant 0 : index
      %c0_126 = arith.constant 0 : index
      %299 = vector.load %arg21[%c0_125, %c0_126] : memref<2x32xf32, #tpu.memory_space<vmem>>, vector<2x32xf32>
      tpu.vector_store %arg21[%c0_125, %c0_126], %298 {strides = array<i32>} : memref<2x32xf32, #tpu.memory_space<vmem>>, vector<2x32xf32>,
    } else {
    }
    %c0 = arith.constant 0 : index
    %c0_1 = arith.constant 0 : index
    %3 = vector.load %arg15[%c0, %c0_1] : memref<64x8xbf16, #tpu.memory_space<vmem>>, vector<64x8xbf16>
    %c0_2 = arith.constant 0 : index
    %c0_3 = arith.constant 0 : index
    %4 = vector.load %arg16[%c0_2, %c0_3] : memref<8x64xf32, #tpu.memory_space<vmem>>, vector<8x64xf32>
    %c0_4 = arith.constant 0 : index
    %c0_5 = arith.constant 0 : index
    %5 = vector.load %arg21[%c0_4, %c0_5] : memref<2x32xf32, #tpu.memory_space<vmem>>, vector<2x32xf32>
    %c0_6 = arith.constant 0 : index
    %c0_7 = arith.constant 0 : index
    %c0_8 = arith.constant 0 : index
    %6 = vector.load %arg1[%c0_6, %c0_7, %c0_8] : memref<1x10x32xf32, #tpu.memory_space<vmem>>, vector<1x1x32xf32>
    %7 = vector.shape_cast %6 : vector<1x1x32xf32> to vector<1x32xf32>
    %c0_9 = arith.constant 0 : index
    %c1 = arith.constant 1 : index
    %c0_10 = arith.constant 0 : index
    %8 = vector.load %arg1[%c0_9, %c1, %c0_10] : memref<1x10x32xf32, #tpu.memory_space<vmem>>, vector<1x1x32xf32>
    %9 = vector.shape_cast %8 : vector<1x1x32xf32> to vector<1x32xf32>
    %cst = arith.constant dense<0.000000e+00> : vector<2xf32>
    %10 = vector.multi_reduction <add>, %5, %cst [1] : vector<2x32xf32> to vector<2xf32>
    %11 = vector.shape_cast %10 : vector<2xf32> to vector<2x1xf32>
    %cst_11 = arith.constant 3.200000e+01 : f32
    %12 = vector.broadcast %cst_11 : f32 to vector<2x1xf32>
    %13 = arith.divf %11, %12 : vector<2x1xf32>
    %14 = vector.broadcast %13 : vector<2x1xf32> to vector<2x32xf32>
    %15 = arith.subf %5, %14 : vector<2x32xf32>
    %16 = arith.mulf %15, %15 : vector<2x32xf32>
    %cst_12 = arith.constant dense<0.000000e+00> : vector<2xf32>
    %17 = vector.multi_reduction <add>, %16, %cst_12 [1] : vector<2x32xf32> to vector<2xf32>
    %18 = vector.shape_cast %17 : vector<2xf32> to vector<2x1xf32>
    %cst_13 = arith.constant 3.200000e+01 : f32
    %19 = vector.broadcast %cst_13 : f32 to vector<2x1xf32>
    %20 = arith.divf %18, %19 : vector<2x1xf32>
    %21 = vector.broadcast %13 : vector<2x1xf32> to vector<2x32xf32>
    %22 = arith.subf %5, %21 : vector<2x32xf32>
    %cst_14 = arith.constant 9.99999974E-6 : f32
    %23 = vector.broadcast %cst_14 : f32 to vector<2x1xf32>
    %24 = arith.addf %20, %23 : vector<2x1xf32>
    %25 = math.rsqrt %24 : vector<2x1xf32>
    %26 = vector.broadcast %25 : vector<2x1xf32> to vector<2x32xf32>
    %27 = arith.mulf %22, %26 : vector<2x32xf32>
    %28 = vector.broadcast %7 : vector<1x32xf32> to vector<2x32xf32>
    %29 = arith.mulf %27, %28 : vector<2x32xf32>
    %30 = vector.broadcast %9 : vector<1x32xf32> to vector<2x32xf32>
    %31 = arith.addf %29, %30 : vector<2x32xf32>
    %32 = arith.truncf %31 : vector<2x32xf32> to vector<2x32xbf16>
    %c0_15 = arith.constant 0 : index
    %c0_16 = arith.constant 0 : index
    %c0_17 = arith.constant 0 : index
    %33 = vector.load %arg3[%c0_15, %c0_16, %c0_17] : memref<1x32x96xbf16, #tpu.memory_space<vmem>>, vector<1x32x96xbf16>
    %34 = vector.shape_cast %33 : vector<1x32x96xbf16> to vector<32x96xbf16>
    %cst_18 = arith.constant dense<0.000000e+00> : vector<2x96xf32>
    %35 = tpu.matmul %32, %34, %cst_18 {dimension_numbers = #tpu.dot_dimension_numbers<[1], [0], [0], [1], [0, 0, 1, 1], [], []>} : vector<2x32xbf16>, vector<32x96xbf16>, vector<2x96xf32> -> vector<2x96xf32>
    %36 = vector.extract_strided_slice %35 {offsets = [0, 0], sizes = [2, 32], strides = [1, 1]} : vector<2x96xf32> to vector<2x32xf32>
    %37 = vector.extract_strided_slice %36 {offsets = [0, 0], sizes = [1, 32], strides = [1, 1]} : vector<2x32xf32> to vector<1x32xf32>
    %38 = vector.extract_strided_slice %36 {offsets = [1, 0], sizes = [1, 32], strides = [1, 1]} : vector<2x32xf32> to vector<1x32xf32>
    %39 = tpu.concatenate %37, %38 in 1 : vector<1x32xf32>, vector<1x32xf32> -> vector<1x64xf32>
    %cst_19 = arith.constant 0.353553385 : f32
    %40 = vector.broadcast %cst_19 : f32 to vector<1x64xf32>
    %41 = arith.mulf %39, %40 : vector<1x64xf32>
    %42 = arith.truncf %41 : vector<1x64xf32> to vector<1x64xbf16>
    %43 = vector.extract_strided_slice %35 {offsets = [0, 32], sizes = [2, 32], strides = [1, 1]} : vector<2x96xf32> to vector<2x32xf32>
    %44 = vector.extract_strided_slice %43 {offsets = [0, 0], sizes = [1, 32], strides = [1, 1]} : vector<2x32xf32> to vector<1x32xf32>
    %45 = vector.extract_strided_slice %43 {offsets = [1, 0], sizes = [1, 32], strides = [1, 1]} : vector<2x32xf32> to vector<1x32xf32>
    %46 = tpu.concatenate %44, %45 in 1 : vector<1x32xf32>, vector<1x32xf32> -> vector<1x64xf32>
    %47 = arith.truncf %46 : vector<1x64xf32> to vector<1x64xbf16>
    %48 = vector.extract_strided_slice %35 {offsets = [0, 64], sizes = [2, 32], strides = [1, 1]} : vector<2x96xf32> to vector<2x32xf32>
    %49 = vector.extract_strided_slice %48 {offsets = [0, 0], sizes = [1, 32], strides = [1, 1]} : vector<2x32xf32> to vector<1x32xf32>
    %50 = vector.extract_strided_slice %48 {offsets = [1, 0], sizes = [1, 32], strides = [1, 1]} : vector<2x32xf32> to vector<1x32xf32>
    %51 = tpu.concatenate %49, %50 in 1 : vector<1x32xf32>, vector<1x32xf32> -> vector<1x64xf32>
    %52 = arith.truncf %51 : vector<1x64xf32> to vector<1x64xbf16>
    %53 = tpu.concatenate %47, %52 in 1 : vector<1x64xbf16>, vector<1x64xbf16> -> vector<1x128xbf16>
    %c0_20 = arith.constant 0 : index
    %c0_21 = arith.constant 0 : index
    %c0_22 = arith.constant 0 : index
    %54 = vector.load %arg19[%c0_20, %c0_21, %c0_22] : memref<1x1x128xbf16, #tpu.memory_space<vmem>>, vector<1x1x128xbf16>
    %55 = vector.shape_cast %54 : vector<1x1x128xbf16> to vector<1x128xbf16>
    %56 = vector.shape_cast %53 : vector<1x128xbf16> to vector<1x1x128xbf16>
    tpu.vector_store %arg19[%c0_20, %c0_21, %c0_22], %56 {strides = array<i32>} : memref<1x1x128xbf16, #tpu.memory_space<vmem>>, vector<1x1x128xbf16>,
    %c0_23 = arith.constant 0 : index
    %c0_24 = arith.constant 0 : index
    %57 = vector.load %arg13[%c0_23, %c0_24] : memref<16x1xf32, #tpu.memory_space<vmem>>, vector<16x1xf32>
    %cst_25 = arith.constant 0.000000e+00 : f32
    %58 = vector.broadcast %cst_25 : f32 to vector<16x1xf32>
    %59 = arith.cmpf one, %57, %58 : vector<16x1xf32>
    %c0_26 = arith.constant 0 : index
    %c0_27 = arith.constant 0 : index
    %c0_28 = arith.constant 0 : index
    %60 = vector.load %arg10[%c0_26, %c0_27, %c0_28] : memref<1x16x128xbf16, #tpu.memory_space<vmem>>, vector<1x16x128xbf16>
    %61 = vector.shape_cast %60 : vector<1x16x128xbf16> to vector<16x128xbf16>
    %62 = vector.shape_cast %59 : vector<16x1xi1> to vector<16x1xi1>
    %63 = vector.broadcast %62 : vector<16x1xi1> to vector<16x128xi1>
    %64 = vector.shape_cast %53 : vector<1x128xbf16> to vector<1x128xbf16>
    %65 = vector.broadcast %64 : vector<1x128xbf16> to vector<16x128xbf16>
    %66 = arith.select %63, %65, %61 : vector<16x128xi1>, vector<16x128xbf16>
    %67 = vector.extract_strided_slice %66 {offsets = [0, 0], sizes = [16, 64], strides = [1, 1]} : vector<16x128xbf16> to vector<16x64xbf16>
    %68 = vector.extract_strided_slice %66 {offsets = [0, 64], sizes = [16, 64], strides = [1, 1]} : vector<16x128xbf16> to vector<16x64xbf16>
    %c0_29 = arith.constant 0 : index
    %c0_30 = arith.constant 0 : index
    %69 = vector.load %arg12[%c0_29, %c0_30] : memref<16x8xf32, #tpu.memory_space<vmem>>, vector<16x8xf32>
    %70 = vector.broadcast %42 : vector<1x64xbf16> to vector<16x64xbf16>
    %71 = arith.mulf %67, %70 : vector<16x64xbf16>
    %cst_31 = arith.constant dense<0.000000e+00> : vector<16x8xf32>
    %72 = tpu.matmul %71, %3, %cst_31 {dimension_numbers = #tpu.dot_dimension_numbers<[1], [0], [0], [1], [0, 0, 1, 1], [], []>} : vector<16x64xbf16>, vector<64x8xbf16>, vector<16x8xf32> -> vector<16x8xf32>
    %73 = arith.addf %72, %69 : vector<16x8xf32>
    %cst_32 = arith.constant dense<0xFF800000> : vector<8xf32>
    %74 = vector.multi_reduction <maximumf>, %73, %cst_32 [0] : vector<16x8xf32> to vector<8xf32>
    %75 = vector.shape_cast %74 : vector<8xf32> to vector<1x8xf32>
    %76 = vector.broadcast %75 : vector<1x8xf32> to vector<16x8xf32>
    %77 = arith.subf %73, %76 : vector<16x8xf32>
    %78 = math.exp %77 : vector<16x8xf32>
    %cst_33 = arith.constant dense<0.000000e+00> : vector<8xf32>
    %79 = vector.multi_reduction <add>, %78, %cst_33 [0] : vector<16x8xf32> to vector<8xf32>
    %80 = vector.shape_cast %79 : vector<8xf32> to vector<1x8xf32>
    %81 = tpu.reciprocal %80 {approx = true} : vector<1x8xf32> -> vector<1x8xf32>
    %82 = vector.broadcast %81 : vector<1x8xf32> to vector<16x8xf32>
    %83 = arith.mulf %78, %82 : vector<16x8xf32>
    %84 = arith.truncf %83 : vector<16x8xf32> to vector<16x8xbf16>
    %cst_34 = arith.constant dense<0.000000e+00> : vector<8x64xf32>
    %85 = tpu.matmul %84, %68, %cst_34 {dimension_numbers = #tpu.dot_dimension_numbers<[0], [0], [1], [1], [0, 1, 1, 1], [], []>} : vector<16x8xbf16>, vector<16x64xbf16>, vector<8x64xf32> -> vector<8x64xf32>
    %86 = arith.mulf %85, %4 : vector<8x64xf32>
    %cst_35 = arith.constant dense<0.000000e+00> : vector<64xf32>
    %87 = vector.multi_reduction <add>, %86, %cst_35 [0] : vector<8x64xf32> to vector<64xf32>
    %88 = vector.shape_cast %87 : vector<64xf32> to vector<1x64xf32>
    %89 = vector.extract_strided_slice %88 {offsets = [0, 0], sizes = [1, 32], strides = [1, 1]} : vector<1x64xf32> to vector<1x32xf32>
    %90 = vector.extract_strided_slice %88 {offsets = [0, 32], sizes = [1, 32], strides = [1, 1]} : vector<1x64xf32> to vector<1x32xf32>
    %91 = tpu.concatenate %89, %90 in 0 : vector<1x32xf32>, vector<1x32xf32> -> vector<2x32xf32>
    %92 = arith.truncf %91 : vector<2x32xf32> to vector<2x32xbf16>
    %c0_36 = arith.constant 0 : index
    %c0_37 = arith.constant 0 : index
    %c0_38 = arith.constant 0 : index
    %93 = vector.load %arg4[%c0_36, %c0_37, %c0_38] : memref<1x32x32xbf16, #tpu.memory_space<vmem>>, vector<1x32x32xbf16>
    %94 = vector.shape_cast %93 : vector<1x32x32xbf16> to vector<32x32xbf16>
    %cst_39 = arith.constant dense<0.000000e+00> : vector<2x32xf32>
    %95 = tpu.matmul %92, %94, %cst_39 {dimension_numbers = #tpu.dot_dimension_numbers<[1], [0], [0], [1], [0, 0, 1, 1], [], []>} : vector<2x32xbf16>, vector<32x32xbf16>, vector<2x32xf32> -> vector<2x32xf32>
    %c0_40 = arith.constant 0 : index
    %c2 = arith.constant 2 : index
    %c0_41 = arith.constant 0 : index
    %96 = vector.load %arg1[%c0_40, %c2, %c0_41] : memref<1x10x32xf32, #tpu.memory_space<vmem>>, vector<1x1x32xf32>
    %97 = vector.shape_cast %96 : vector<1x1x32xf32> to vector<1x32xf32>
    %c0_42 = arith.constant 0 : index
    %c3 = arith.constant 3 : index
    %c0_43 = arith.constant 0 : index
    %98 = vector.load %arg1[%c0_42, %c3, %c0_43] : memref<1x10x32xf32, #tpu.memory_space<vmem>>, vector<1x1x32xf32>
    %99 = vector.shape_cast %98 : vector<1x1x32xf32> to vector<1x32xf32>
    %cst_44 = arith.constant dense<0.000000e+00> : vector<2xf32>
    %100 = vector.multi_reduction <add>, %95, %cst_44 [1] : vector<2x32xf32> to vector<2xf32>
    %101 = vector.shape_cast %100 : vector<2xf32> to vector<2x1xf32>
    %cst_45 = arith.constant 3.200000e+01 : f32
    %102 = vector.broadcast %cst_45 : f32 to vector<2x1xf32>
    %103 = arith.divf %101, %102 : vector<2x1xf32>
    %104 = vector.broadcast %103 : vector<2x1xf32> to vector<2x32xf32>
    %105 = arith.subf %95, %104 : vector<2x32xf32>
    %106 = arith.mulf %105, %105 : vector<2x32xf32>
    %cst_46 = arith.constant dense<0.000000e+00> : vector<2xf32>
    %107 = vector.multi_reduction <add>, %106, %cst_46 [1] : vector<2x32xf32> to vector<2xf32>
    %108 = vector.shape_cast %107 : vector<2xf32> to vector<2x1xf32>
    %cst_47 = arith.constant 3.200000e+01 : f32
    %109 = vector.broadcast %cst_47 : f32 to vector<2x1xf32>
    %110 = arith.divf %108, %109 : vector<2x1xf32>
    %111 = vector.broadcast %103 : vector<2x1xf32> to vector<2x32xf32>
    %112 = arith.subf %95, %111 : vector<2x32xf32>
    %cst_48 = arith.constant 9.99999974E-6 : f32
    %113 = vector.broadcast %cst_48 : f32 to vector<2x1xf32>
    %114 = arith.addf %110, %113 : vector<2x1xf32>
    %115 = math.rsqrt %114 : vector<2x1xf32>
    %116 = vector.broadcast %115 : vector<2x1xf32> to vector<2x32xf32>
    %117 = arith.mulf %112, %116 : vector<2x32xf32>
    %118 = vector.broadcast %97 : vector<1x32xf32> to vector<2x32xf32>
    %119 = arith.mulf %117, %118 : vector<2x32xf32>
    %120 = vector.broadcast %99 : vector<1x32xf32> to vector<2x32xf32>
    %121 = arith.addf %119, %120 : vector<2x32xf32>
    %122 = arith.addf %5, %121 : vector<2x32xf32>
    %c0_49 = arith.constant 0 : index
    %c4 = arith.constant 4 : index
    %c0_50 = arith.constant 0 : index
    %123 = vector.load %arg1[%c0_49, %c4, %c0_50] : memref<1x10x32xf32, #tpu.memory_space<vmem>>, vector<1x1x32xf32>
    %124 = vector.shape_cast %123 : vector<1x1x32xf32> to vector<1x32xf32>
    %c0_51 = arith.constant 0 : index
    %c5 = arith.constant 5 : index
    %c0_52 = arith.constant 0 : index
    %125 = vector.load %arg1[%c0_51, %c5, %c0_52] : memref<1x10x32xf32, #tpu.memory_space<vmem>>, vector<1x1x32xf32>
    %126 = vector.shape_cast %125 : vector<1x1x32xf32> to vector<1x32xf32>
    %cst_53 = arith.constant dense<0.000000e+00> : vector<2xf32>
    %127 = vector.multi_reduction <add>, %122, %cst_53 [1] : vector<2x32xf32> to vector<2xf32>
    %128 = vector.shape_cast %127 : vector<2xf32> to vector<2x1xf32>
    %cst_54 = arith.constant 3.200000e+01 : f32
    %129 = vector.broadcast %cst_54 : f32 to vector<2x1xf32>
    %130 = arith.divf %128, %129 : vector<2x1xf32>
    %131 = vector.broadcast %130 : vector<2x1xf32> to vector<2x32xf32>
    %132 = arith.subf %122, %131 : vector<2x32xf32>
    %133 = arith.mulf %132, %132 : vector<2x32xf32>
    %cst_55 = arith.constant dense<0.000000e+00> : vector<2xf32>
    %134 = vector.multi_reduction <add>, %133, %cst_55 [1] : vector<2x32xf32> to vector<2xf32>
    %135 = vector.shape_cast %134 : vector<2xf32> to vector<2x1xf32>
    %cst_56 = arith.constant 3.200000e+01 : f32
    %136 = vector.broadcast %cst_56 : f32 to vector<2x1xf32>
    %137 = arith.divf %135, %136 : vector<2x1xf32>
    %138 = vector.broadcast %130 : vector<2x1xf32> to vector<2x32xf32>
    %139 = arith.subf %122, %138 : vector<2x32xf32>
    %cst_57 = arith.constant 9.99999974E-6 : f32
    %140 = vector.broadcast %cst_57 : f32 to vector<2x1xf32>
    %141 = arith.addf %137, %140 : vector<2x1xf32>
    %142 = math.rsqrt %141 : vector<2x1xf32>
    %143 = vector.broadcast %142 : vector<2x1xf32> to vector<2x32xf32>
    %144 = arith.mulf %139, %143 : vector<2x32xf32>
    %145 = vector.broadcast %124 : vector<1x32xf32> to vector<2x32xf32>
    %146 = arith.mulf %144, %145 : vector<2x32xf32>
    %147 = vector.broadcast %126 : vector<1x32xf32> to vector<2x32xf32>
    %148 = arith.addf %146, %147 : vector<2x32xf32>
    %149 = arith.truncf %148 : vector<2x32xf32> to vector<2x32xbf16>
    %c0_58 = arith.constant 0 : index
    %c0_59 = arith.constant 0 : index
    %c0_60 = arith.constant 0 : index
    %150 = vector.load %arg5[%c0_58, %c0_59, %c0_60] : memref<1x32x32xbf16, #tpu.memory_space<vmem>>, vector<1x32x32xbf16>
    %151 = vector.shape_cast %150 : vector<1x32x32xbf16> to vector<32x32xbf16>
    %cst_61 = arith.constant dense<0.000000e+00> : vector<2x32xf32>
    %152 = tpu.matmul %149, %151, %cst_61 {dimension_numbers = #tpu.dot_dimension_numbers<[1], [0], [0], [1], [0, 0, 1, 1], [], []>} : vector<2x32xbf16>, vector<32x32xbf16>, vector<2x32xf32> -> vector<2x32xf32>
    %153 = vector.extract_strided_slice %152 {offsets = [0, 0], sizes = [1, 32], strides = [1, 1]} : vector<2x32xf32> to vector<1x32xf32>
    %154 = vector.extract_strided_slice %152 {offsets = [1, 0], sizes = [1, 32], strides = [1, 1]} : vector<2x32xf32> to vector<1x32xf32>
    %155 = tpu.concatenate %153, %154 in 1 : vector<1x32xf32>, vector<1x32xf32> -> vector<1x64xf32>
    %cst_62 = arith.constant 0.353553385 : f32
    %156 = vector.broadcast %cst_62 : f32 to vector<1x64xf32>
    %157 = arith.mulf %155, %156 : vector<1x64xf32>
    %158 = arith.truncf %157 : vector<1x64xf32> to vector<1x64xbf16>
    %c0_63 = arith.constant 0 : index
    %c0_64 = arith.constant 0 : index
    %c0_65 = arith.constant 0 : index
    %159 = vector.load %arg9[%c0_63, %c0_64, %c0_65] : memref<1x8x128xbf16, #tpu.memory_space<vmem>>, vector<1x8x64xbf16>
    %160 = vector.shape_cast %159 : vector<1x8x64xbf16> to vector<8x64xbf16>
    %c0_66 = arith.constant 0 : index
    %c0_67 = arith.constant 0 : index
    %c64 = arith.constant 64 : index
    %161 = vector.load %arg9[%c0_66, %c0_67, %c64] : memref<1x8x128xbf16, #tpu.memory_space<vmem>>, vector<1x8x64xbf16>
    %162 = vector.shape_cast %161 : vector<1x8x64xbf16> to vector<8x64xbf16>
    %c0_68 = arith.constant 0 : index
    %c0_69 = arith.constant 0 : index
    %163 = vector.load %arg14[%c0_68, %c0_69] : memref<8x8xf32, #tpu.memory_space<vmem>>, vector<8x8xf32>
    %164 = vector.broadcast %158 : vector<1x64xbf16> to vector<8x64xbf16>
    %165 = arith.mulf %160, %164 : vector<8x64xbf16>
    %cst_70 = arith.constant dense<0.000000e+00> : vector<8x8xf32>
    %166 = tpu.matmul %165, %3, %cst_70 {dimension_numbers = #tpu.dot_dimension_numbers<[1], [0], [0], [1], [0, 0, 1, 1], [], []>} : vector<8x64xbf16>, vector<64x8xbf16>, vector<8x8xf32> -> vector<8x8xf32>
    %167 = arith.addf %166, %163 : vector<8x8xf32>
    %cst_71 = arith.constant dense<0xFF800000> : vector<8xf32>
    %168 = vector.multi_reduction <maximumf>, %167, %cst_71 [0] : vector<8x8xf32> to vector<8xf32>
    %169 = vector.shape_cast %168 : vector<8xf32> to vector<1x8xf32>
    %170 = vector.broadcast %169 : vector<1x8xf32> to vector<8x8xf32>
    %171 = arith.subf %167, %170 : vector<8x8xf32>
    %172 = math.exp %171 : vector<8x8xf32>
    %cst_72 = arith.constant dense<0.000000e+00> : vector<8xf32>
    %173 = vector.multi_reduction <add>, %172, %cst_72 [0] : vector<8x8xf32> to vector<8xf32>
    %174 = vector.shape_cast %173 : vector<8xf32> to vector<1x8xf32>
    %175 = tpu.reciprocal %174 {approx = true} : vector<1x8xf32> -> vector<1x8xf32>
    %176 = vector.broadcast %175 : vector<1x8xf32> to vector<8x8xf32>
    %177 = arith.mulf %172, %176 : vector<8x8xf32>
    %178 = arith.truncf %177 : vector<8x8xf32> to vector<8x8xbf16>
    %cst_73 = arith.constant dense<0.000000e+00> : vector<8x64xf32>
    %179 = tpu.matmul %178, %162, %cst_73 {dimension_numbers = #tpu.dot_dimension_numbers<[0], [0], [1], [1], [0, 1, 1, 1], [], []>} : vector<8x8xbf16>, vector<8x64xbf16>, vector<8x64xf32> -> vector<8x64xf32>
    %180 = arith.mulf %179, %4 : vector<8x64xf32>
    %cst_74 = arith.constant dense<0.000000e+00> : vector<64xf32>
    %181 = vector.multi_reduction <add>, %180, %cst_74 [0] : vector<8x64xf32> to vector<64xf32>
    %182 = vector.shape_cast %181 : vector<64xf32> to vector<1x64xf32>
    %183 = vector.extract_strided_slice %182 {offsets = [0, 0], sizes = [1, 32], strides = [1, 1]} : vector<1x64xf32> to vector<1x32xf32>
    %184 = vector.extract_strided_slice %182 {offsets = [0, 32], sizes = [1, 32], strides = [1, 1]} : vector<1x64xf32> to vector<1x32xf32>
    %185 = tpu.concatenate %183, %184 in 0 : vector<1x32xf32>, vector<1x32xf32> -> vector<2x32xf32>
    %186 = arith.truncf %185 : vector<2x32xf32> to vector<2x32xbf16>
    %c0_75 = arith.constant 0 : index
    %c0_76 = arith.constant 0 : index
    %c0_77 = arith.constant 0 : index
    %187 = vector.load %arg6[%c0_75, %c0_76, %c0_77] : memref<1x32x32xbf16, #tpu.memory_space<vmem>>, vector<1x32x32xbf16>
    %188 = vector.shape_cast %187 : vector<1x32x32xbf16> to vector<32x32xbf16>
    %cst_78 = arith.constant dense<0.000000e+00> : vector<2x32xf32>
    %189 = tpu.matmul %186, %188, %cst_78 {dimension_numbers = #tpu.dot_dimension_numbers<[1], [0], [0], [1], [0, 0, 1, 1], [], []>} : vector<2x32xbf16>, vector<32x32xbf16>, vector<2x32xf32> -> vector<2x32xf32>
    %c0_79 = arith.constant 0 : index
    %c6 = arith.constant 6 : index
    %c0_80 = arith.constant 0 : index
    %190 = vector.load %arg1[%c0_79, %c6, %c0_80] : memref<1x10x32xf32, #tpu.memory_space<vmem>>, vector<1x1x32xf32>
    %191 = vector.shape_cast %190 : vector<1x1x32xf32> to vector<1x32xf32>
    %c0_81 = arith.constant 0 : index
    %c7 = arith.constant 7 : index
    %c0_82 = arith.constant 0 : index
    %192 = vector.load %arg1[%c0_81, %c7, %c0_82] : memref<1x10x32xf32, #tpu.memory_space<vmem>>, vector<1x1x32xf32>
    %193 = vector.shape_cast %192 : vector<1x1x32xf32> to vector<1x32xf32>
    %cst_83 = arith.constant dense<0.000000e+00> : vector<2xf32>
    %194 = vector.multi_reduction <add>, %189, %cst_83 [1] : vector<2x32xf32> to vector<2xf32>
    %195 = vector.shape_cast %194 : vector<2xf32> to vector<2x1xf32>
    %cst_84 = arith.constant 3.200000e+01 : f32
    %196 = vector.broadcast %cst_84 : f32 to vector<2x1xf32>
    %197 = arith.divf %195, %196 : vector<2x1xf32>
    %198 = vector.broadcast %197 : vector<2x1xf32> to vector<2x32xf32>
    %199 = arith.subf %189, %198 : vector<2x32xf32>
    %200 = arith.mulf %199, %199 : vector<2x32xf32>
    %cst_85 = arith.constant dense<0.000000e+00> : vector<2xf32>
    %201 = vector.multi_reduction <add>, %200, %cst_85 [1] : vector<2x32xf32> to vector<2xf32>
    %202 = vector.shape_cast %201 : vector<2xf32> to vector<2x1xf32>
    %cst_86 = arith.constant 3.200000e+01 : f32
    %203 = vector.broadcast %cst_86 : f32 to vector<2x1xf32>
    %204 = arith.divf %202, %203 : vector<2x1xf32>
    %205 = vector.broadcast %197 : vector<2x1xf32> to vector<2x32xf32>
    %206 = arith.subf %189, %205 : vector<2x32xf32>
    %cst_87 = arith.constant 9.99999974E-6 : f32
    %207 = vector.broadcast %cst_87 : f32 to vector<2x1xf32>
    %208 = arith.addf %204, %207 : vector<2x1xf32>
    %209 = math.rsqrt %208 : vector<2x1xf32>
    %210 = vector.broadcast %209 : vector<2x1xf32> to vector<2x32xf32>
    %211 = arith.mulf %206, %210 : vector<2x32xf32>
    %212 = vector.broadcast %191 : vector<1x32xf32> to vector<2x32xf32>
    %213 = arith.mulf %211, %212 : vector<2x32xf32>
    %214 = vector.broadcast %193 : vector<1x32xf32> to vector<2x32xf32>
    %215 = arith.addf %213, %214 : vector<2x32xf32>
    %216 = arith.addf %122, %215 : vector<2x32xf32>
    %c0_88 = arith.constant 0 : index
    %c8 = arith.constant 8 : index
    %c0_89 = arith.constant 0 : index
    %217 = vector.load %arg1[%c0_88, %c8, %c0_89] : memref<1x10x32xf32, #tpu.memory_space<vmem>>, vector<1x1x32xf32>
    %218 = vector.shape_cast %217 : vector<1x1x32xf32> to vector<1x32xf32>
    %c0_90 = arith.constant 0 : index
    %c9 = arith.constant 9 : index
    %c0_91 = arith.constant 0 : index
    %219 = vector.load %arg1[%c0_90, %c9, %c0_91] : memref<1x10x32xf32, #tpu.memory_space<vmem>>, vector<1x1x32xf32>
    %220 = vector.shape_cast %219 : vector<1x1x32xf32> to vector<1x32xf32>
    %cst_92 = arith.constant dense<0.000000e+00> : vector<2xf32>
    %221 = vector.multi_reduction <add>, %216, %cst_92 [1] : vector<2x32xf32> to vector<2xf32>
    %222 = vector.shape_cast %221 : vector<2xf32> to vector<2x1xf32>
    %cst_93 = arith.constant 3.200000e+01 : f32
    %223 = vector.broadcast %cst_93 : f32 to vector<2x1xf32>
    %224 = arith.divf %222, %223 : vector<2x1xf32>
    %225 = vector.broadcast %224 : vector<2x1xf32> to vector<2x32xf32>
    %226 = arith.subf %216, %225 : vector<2x32xf32>
    %227 = arith.mulf %226, %226 : vector<2x32xf32>
    %cst_94 = arith.constant dense<0.000000e+00> : vector<2xf32>
    %228 = vector.multi_reduction <add>, %227, %cst_94 [1] : vector<2x32xf32> to vector<2xf32>
    %229 = vector.shape_cast %228 : vector<2xf32> to vector<2x1xf32>
    %cst_95 = arith.constant 3.200000e+01 : f32
    %230 = vector.broadcast %cst_95 : f32 to vector<2x1xf32>
    %231 = arith.divf %229, %230 : vector<2x1xf32>
    %232 = vector.broadcast %224 : vector<2x1xf32> to vector<2x32xf32>
    %233 = arith.subf %216, %232 : vector<2x32xf32>
    %cst_96 = arith.constant 9.99999974E-6 : f32
    %234 = vector.broadcast %cst_96 : f32 to vector<2x1xf32>
    %235 = arith.addf %231, %234 : vector<2x1xf32>
    %236 = math.rsqrt %235 : vector<2x1xf32>
    %237 = vector.broadcast %236 : vector<2x1xf32> to vector<2x32xf32>
    %238 = arith.mulf %233, %237 : vector<2x32xf32>
    %239 = vector.broadcast %218 : vector<1x32xf32> to vector<2x32xf32>
    %240 = arith.mulf %238, %239 : vector<2x32xf32>
    %241 = vector.broadcast %220 : vector<1x32xf32> to vector<2x32xf32>
    %242 = arith.addf %240, %241 : vector<2x32xf32>
    %243 = arith.truncf %242 : vector<2x32xf32> to vector<2x32xbf16>
    %c0_97 = arith.constant 0 : index
    %c0_98 = arith.constant 0 : index
    %c0_99 = arith.constant 0 : index
    %244 = vector.load %arg7[%c0_97, %c0_98, %c0_99] : memref<1x32x128xbf16, #tpu.memory_space<vmem>>, vector<1x32x128xbf16>
    %245 = vector.shape_cast %244 : vector<1x32x128xbf16> to vector<32x128xbf16>
    %cst_100 = arith.constant dense<0.000000e+00> : vector<2x128xf32>
    %246 = tpu.matmul %243, %245, %cst_100 {dimension_numbers = #tpu.dot_dimension_numbers<[1], [0], [0], [1], [0, 0, 1, 1], [], []>} : vector<2x32xbf16>, vector<32x128xbf16>, vector<2x128xf32> -> vector<2x128xf32>
    %247 = vector.extract_strided_slice %246 {offsets = [0, 0], sizes = [2, 64], strides = [1, 1]} : vector<2x128xf32> to vector<2x64xf32>
    %248 = arith.mulf %247, %247 : vector<2x64xf32>
    %249 = arith.mulf %247, %248 : vector<2x64xf32>
    %cst_101 = arith.constant 4.471500e-02 : f32
    %250 = vector.broadcast %cst_101 : f32 to vector<2x64xf32>
    %251 = arith.mulf %250, %249 : vector<2x64xf32>
    %252 = arith.addf %247, %251 : vector<2x64xf32>
    %cst_102 = arith.constant 0.797884583 : f32
    %253 = vector.broadcast %cst_102 : f32 to vector<2x64xf32>
    %254 = arith.mulf %253, %252 : vector<2x64xf32>
    %255 = math.tanh %254 : vector<2x64xf32>
    %cst_103 = arith.constant 1.000000e+00 : f32
    %256 = vector.broadcast %cst_103 : f32 to vector<2x64xf32>
    %257 = arith.addf %256, %255 : vector<2x64xf32>
    %cst_104 = arith.constant 5.000000e-01 : f32
    %258 = vector.broadcast %cst_104 : f32 to vector<2x64xf32>
    %259 = arith.mulf %258, %257 : vector<2x64xf32>
    %260 = arith.mulf %247, %259 : vector<2x64xf32>
    %261 = vector.extract_strided_slice %246 {offsets = [0, 64], sizes = [2, 64], strides = [1, 1]} : vector<2x128xf32> to vector<2x64xf32>
    %262 = arith.mulf %260, %261 : vector<2x64xf32>
    %c0_105 = arith.constant 0 : index
    %c0_106 = arith.constant 0 : index
    %c0_107 = arith.constant 0 : index
    %263 = vector.load %arg2[%c0_105, %c0_106, %c0_107] : memref<1x2x64xf32, #tpu.memory_space<vmem>>, vector<1x1x64xf32>
    %264 = vector.shape_cast %263 : vector<1x1x64xf32> to vector<1x64xf32>
    %c0_108 = arith.constant 0 : index
    %c1_109 = arith.constant 1 : index
    %c0_110 = arith.constant 0 : index
    %265 = vector.load %arg2[%c0_108, %c1_109, %c0_110] : memref<1x2x64xf32, #tpu.memory_space<vmem>>, vector<1x1x64xf32>
    %266 = vector.shape_cast %265 : vector<1x1x64xf32> to vector<1x64xf32>
    %cst_111 = arith.constant dense<0.000000e+00> : vector<2xf32>
    %267 = vector.multi_reduction <add>, %262, %cst_111 [1] : vector<2x64xf32> to vector<2xf32>
    %268 = vector.shape_cast %267 : vector<2xf32> to vector<2x1xf32>
    %cst_112 = arith.constant 6.400000e+01 : f32
    %269 = vector.broadcast %cst_112 : f32 to vector<2x1xf32>
    %270 = arith.divf %268, %269 : vector<2x1xf32>
    %271 = vector.broadcast %270 : vector<2x1xf32> to vector<2x64xf32>
    %272 = arith.subf %262, %271 : vector<2x64xf32>
    %273 = arith.mulf %272, %272 : vector<2x64xf32>
    %cst_113 = arith.constant dense<0.000000e+00> : vector<2xf32>
    %274 = vector.multi_reduction <add>, %273, %cst_113 [1] : vector<2x64xf32> to vector<2xf32>
    %275 = vector.shape_cast %274 : vector<2xf32> to vector<2x1xf32>
    %cst_114 = arith.constant 6.400000e+01 : f32
    %276 = vector.broadcast %cst_114 : f32 to vector<2x1xf32>
    %277 = arith.divf %275, %276 : vector<2x1xf32>
    %278 = vector.broadcast %270 : vector<2x1xf32> to vector<2x64xf32>
    %279 = arith.subf %262, %278 : vector<2x64xf32>
    %cst_115 = arith.constant 9.99999974E-6 : f32
    %280 = vector.broadcast %cst_115 : f32 to vector<2x1xf32>
    %281 = arith.addf %277, %280 : vector<2x1xf32>
    %282 = math.rsqrt %281 : vector<2x1xf32>
    %283 = vector.broadcast %282 : vector<2x1xf32> to vector<2x64xf32>
    %284 = arith.mulf %279, %283 : vector<2x64xf32>
    %285 = vector.broadcast %264 : vector<1x64xf32> to vector<2x64xf32>
    %286 = arith.mulf %284, %285 : vector<2x64xf32>
    %287 = vector.broadcast %266 : vector<1x64xf32> to vector<2x64xf32>
    %288 = arith.addf %286, %287 : vector<2x64xf32>
    %289 = arith.truncf %288 : vector<2x64xf32> to vector<2x64xbf16>
    %c0_116 = arith.constant 0 : index
    %c0_117 = arith.constant 0 : index
    %c0_118 = arith.constant 0 : index
    %290 = vector.load %arg8[%c0_116, %c0_117, %c0_118] : memref<1x64x32xbf16, #tpu.memory_space<vmem>>, vector<1x64x32xbf16>
    %291 = vector.shape_cast %290 : vector<1x64x32xbf16> to vector<64x32xbf16>
    %cst_119 = arith.constant dense<0.000000e+00> : vector<2x32xf32>
    %292 = tpu.matmul %289, %291, %cst_119 {dimension_numbers = #tpu.dot_dimension_numbers<[1], [0], [0], [1], [0, 0, 1, 1], [], []>} : vector<2x64xbf16>, vector<64x32xbf16>, vector<2x32xf32> -> vector<2x32xf32>
    %293 = arith.addf %216, %292 : vector<2x32xf32>
    %c0_120 = arith.constant 0 : index
    %c0_121 = arith.constant 0 : index
    %294 = vector.load %arg21[%c0_120, %c0_121] : memref<2x32xf32, #tpu.memory_space<vmem>>, vector<2x32xf32>
    tpu.vector_store %arg21[%c0_120, %c0_121], %293 {strides = array<i32>} : memref<2x32xf32, #tpu.memory_space<vmem>>, vector<2x32xf32>,
    %c1_i32 = arith.constant 1 : i32
    %295 = arith.cmpi eq, %arg0, %c1_i32 : i32
    %296 = arith.extui %295 : i1 to i32
    %c0_i32_122 = arith.constant 0 : i32
    %297 = arith.cmpi ne, %296, %c0_i32_122 : i32
    scf.if %297 {
      %c0_123 = arith.constant 0 : index
      %c0_124 = arith.constant 0 : index
      %298 = vector.load %arg17[%c0_123, %c0_124] : memref<2x32xf32, #tpu.memory_space<vmem>>, vector<1x32xf32>
      %c1_125 = arith.constant 1 : index
      %c0_126 = arith.constant 0 : index
      %299 = vector.load %arg17[%c1_125, %c0_126] : memref<2x32xf32, #tpu.memory_space<vmem>>, vector<1x32xf32>
      %cst_127 = arith.constant dense<0.000000e+00> : vector<2xf32>
      %300 = vector.multi_reduction <add>, %293, %cst_127 [1] : vector<2x32xf32> to vector<2xf32>
      %301 = vector.shape_cast %300 : vector<2xf32> to vector<2x1xf32>
      %cst_128 = arith.constant 3.200000e+01 : f32
      %302 = vector.broadcast %cst_128 : f32 to vector<2x1xf32>
      %303 = arith.divf %301, %302 : vector<2x1xf32>
      %304 = vector.broadcast %303 : vector<2x1xf32> to vector<2x32xf32>
      %305 = arith.subf %293, %304 : vector<2x32xf32>
      %306 = arith.mulf %305, %305 : vector<2x32xf32>
      %cst_129 = arith.constant dense<0.000000e+00> : vector<2xf32>
      %307 = vector.multi_reduction <add>, %306, %cst_129 [1] : vector<2x32xf32> to vector<2xf32>
      %308 = vector.shape_cast %307 : vector<2xf32> to vector<2x1xf32>
      %cst_130 = arith.constant 3.200000e+01 : f32
      %309 = vector.broadcast %cst_130 : f32 to vector<2x1xf32>
      %310 = arith.divf %308, %309 : vector<2x1xf32>
      %311 = vector.broadcast %303 : vector<2x1xf32> to vector<2x32xf32>
      %312 = arith.subf %293, %311 : vector<2x32xf32>
      %cst_131 = arith.constant 9.99999974E-6 : f32
      %313 = vector.broadcast %cst_131 : f32 to vector<2x1xf32>
      %314 = arith.addf %310, %313 : vector<2x1xf32>
      %315 = math.rsqrt %314 : vector<2x1xf32>
      %316 = vector.broadcast %315 : vector<2x1xf32> to vector<2x32xf32>
      %317 = arith.mulf %312, %316 : vector<2x32xf32>
      %318 = vector.broadcast %298 : vector<1x32xf32> to vector<2x32xf32>
      %319 = arith.mulf %317, %318 : vector<2x32xf32>
      %320 = vector.broadcast %299 : vector<1x32xf32> to vector<2x32xf32>
      %321 = arith.addf %319, %320 : vector<2x32xf32>
      %322 = arith.truncf %321 : vector<2x32xf32> to vector<2x32xbf16>
      %c0_132 = arith.constant 0 : index
      %c0_133 = arith.constant 0 : index
      %323 = vector.load %arg18[%c0_132, %c0_133] : memref<32x128xbf16, #tpu.memory_space<vmem>>, vector<32x128xbf16>
      %cst_134 = arith.constant dense<0.000000e+00> : vector<2x128xf32>
      %324 = tpu.matmul %322, %323, %cst_134 {dimension_numbers = #tpu.dot_dimension_numbers<[1], [0], [0], [1], [0, 0, 1, 1], [], []>} : vector<2x32xbf16>, vector<32x128xbf16>, vector<2x128xf32> -> vector<2x128xf32>
      %325 = vector.extract_strided_slice %324 {offsets = [0, 0], sizes = [1, 128], strides = [1, 1]} : vector<2x128xf32> to vector<1x128xf32>
      %cst_135 = arith.constant -9.000000e+00 : f32
      %326 = vector.broadcast %cst_135 : f32 to vector<1x128xf32>
      %327 = arith.mulf %326, %325 : vector<1x128xf32>
      %328 = vector.extract_strided_slice %324 {offsets = [1, 0], sizes = [1, 128], strides = [1, 1]} : vector<2x128xf32> to vector<1x128xf32>
      %cst_136 = arith.constant 1.000000e+01 : f32
      %329 = vector.broadcast %cst_136 : f32 to vector<1x128xf32>
      %330 = arith.mulf %329, %328 : vector<1x128xf32>
      %331 = arith.addf %327, %330 : vector<1x128xf32>
      %c0_137 = arith.constant 0 : index
      %c0_138 = arith.constant 0 : index
      %332 = vector.load %arg20[%c0_137, %c0_138] : memref<1x128xf32, #tpu.memory_space<vmem>>, vector<1x128xf32>
      tpu.vector_store %arg20[%c0_137, %c0_138], %331 {strides = array<i32>} : memref<1x128xf32, #tpu.memory_space<vmem>>, vector<1x128xf32>,
    } else {
    }
    return
  }
  func.func @transform_0(%arg0: i32) -> (i32, i32, i32) {
    %c0_i32 = arith.constant 0 : i32
    %c0_i32_0 = arith.constant 0 : i32
    %c0_i32_1 = arith.constant 0 : i32
    return %arg0, %c0_i32, %c0_i32_0 : i32, i32, i32
  }
  func.func @transform_1(%arg0: i32) -> (i32, i32, i32) {
    %c0_i32 = arith.constant 0 : i32
    %c0_i32_0 = arith.constant 0 : i32
    %c0_i32_1 = arith.constant 0 : i32
    return %arg0, %c0_i32, %c0_i32_0 : i32, i32, i32
  }
  func.func @transform_2(%arg0: i32) -> (i32, i32, i32) {
    %c0_i32 = arith.constant 0 : i32
    %c0_i32_0 = arith.constant 0 : i32
    %c0_i32_1 = arith.constant 0 : i32
    return %arg0, %c0_i32, %c0_i32_0 : i32, i32, i32
  }
  func.func @transform_3(%arg0: i32) -> (i32, i32, i32) {
    %c0_i32 = arith.constant 0 : i32
    %c0_i32_0 = arith.constant 0 : i32
    %c0_i32_1 = arith.constant 0 : i32
    return %arg0, %c0_i32, %c0_i32_0 : i32, i32, i32
  }
  func.func @transform_4(%arg0: i32) -> (i32, i32, i32) {
    %c0_i32 = arith.constant 0 : i32
    %c0_i32_0 = arith.constant 0 : i32
    %c0_i32_1 = arith.constant 0 : i32
    return %arg0, %c0_i32, %c0_i32_0 : i32, i32, i32
  }
  func.func @transform_5(%arg0: i32) -> (i32, i32, i32) {
    %c0_i32 = arith.constant 0 : i32
    %c0_i32_0 = arith.constant 0 : i32
    %c0_i32_1 = arith.constant 0 : i32
    return %arg0, %c0_i32, %c0_i32_0 : i32, i32, i32
  }
  func.func @transform_6(%arg0: i32) -> (i32, i32, i32) {
    %c0_i32 = arith.constant 0 : i32
    %c0_i32_0 = arith.constant 0 : i32
    %c0_i32_1 = arith.constant 0 : i32
    return %arg0, %c0_i32, %c0_i32_0 : i32, i32, i32
  }
  func.func @transform_7(%arg0: i32) -> (i32, i32, i32) {
    %c0_i32 = arith.constant 0 : i32
    %c0_i32_0 = arith.constant 0 : i32
    %c0_i32_1 = arith.constant 0 : i32
    return %arg0, %c0_i32, %c0_i32_0 : i32, i32, i32
  }
  func.func @transform_8(%arg0: i32) -> (i32, i32, i32) {
    %c0_i32 = arith.constant 0 : i32
    %c0_i32_0 = arith.constant 0 : i32
    %c0_i32_1 = arith.constant 0 : i32
    return %arg0, %c0_i32, %c0_i32_0 : i32, i32, i32
  }
  func.func @transform_9(%arg0: i32) -> (i32, i32, i32) {
    %c0_i32 = arith.constant 0 : i32
    %c0_i32_0 = arith.constant 0 : i32
    %c0_i32_1 = arith.constant 0 : i32
    return %arg0, %c0_i32, %c0_i32_0 : i32, i32, i32
  }
  func.func @transform_10(%arg0: i32) -> (i32, i32) {
    %c0_i32 = arith.constant 0 : i32
    %c0_i32_0 = arith.constant 0 : i32
    %c0_i32_1 = arith.constant 0 : i32
    return %c0_i32, %c0_i32_0 : i32, i32
  }
  func.func @transform_11(%arg0: i32) -> (i32, i32) {
    %c0_i32 = arith.constant 0 : i32
    %c0_i32_0 = arith.constant 0 : i32
    %c0_i32_1 = arith.constant 0 : i32
    return %c0_i32, %c0_i32_0 : i32, i32
  }
  func.func @transform_12(%arg0: i32) -> (i32, i32) {
    %c0_i32 = arith.constant 0 : i32
    %c0_i32_0 = arith.constant 0 : i32
    %c0_i32_1 = arith.constant 0 : i32
    return %c0_i32, %c0_i32_0 : i32, i32
  }
  func.func @transform_13(%arg0: i32) -> (i32, i32) {
    %c0_i32 = arith.constant 0 : i32
    %c0_i32_0 = arith.constant 0 : i32
    %c0_i32_1 = arith.constant 0 : i32
    return %c0_i32, %c0_i32_0 : i32, i32
  }
  func.func @transform_14(%arg0: i32) -> (i32, i32) {
    %c0_i32 = arith.constant 0 : i32
    %c0_i32_0 = arith.constant 0 : i32
    %c0_i32_1 = arith.constant 0 : i32
    return %c0_i32, %c0_i32_0 : i32, i32
  }
  func.func @transform_15(%arg0: i32) -> (i32, i32) {
    %c0_i32 = arith.constant 0 : i32
    %c0_i32_0 = arith.constant 0 : i32
    %c0_i32_1 = arith.constant 0 : i32
    return %c0_i32, %c0_i32_0 : i32, i32
  }
  func.func @transform_16(%arg0: i32) -> (i32, i32) {
    %c0_i32 = arith.constant 0 : i32
    %c0_i32_0 = arith.constant 0 : i32
    %c0_i32_1 = arith.constant 0 : i32
    return %c0_i32, %c0_i32_0 : i32, i32
  }
  func.func @transform_17(%arg0: i32) -> (i32, i32) {
    %c0_i32 = arith.constant 0 : i32
    %c0_i32_0 = arith.constant 0 : i32
    %c0_i32_1 = arith.constant 0 : i32
    return %c0_i32, %c0_i32_0 : i32, i32
  }
  func.func @transform_18(%arg0: i32) -> (i32, i32, i32) {
    %c0_i32 = arith.constant 0 : i32
    %c0_i32_0 = arith.constant 0 : i32
    %c0_i32_1 = arith.constant 0 : i32
    return %arg0, %c0_i32, %c0_i32_0 : i32, i32, i32
  }
  func.func @transform_19(%arg0: i32) -> (i32, i32) {
    %c0_i32 = arith.constant 0 : i32
    %c0_i32_0 = arith.constant 0 : i32
    %c0_i32_1 = arith.constant 0 : i32
    return %c0_i32, %c0_i32_0 : i32, i32
  }
}

</mosaic_0001>

<bundles_post_ra>
// kernel: custom-call.2
= control target key start
LH: loop header
LB: loop body
LE: loop exit
PB: predicated region body
PF: predicated region fallthrough
CT: control target
= control target key end

     0   :  { %s6_s0 = inlined_call_operand.vmem [shape: s32[4], index: 0, kind: output, shape index: {}]  }

// kernel: closed_call.17
= control target key start
LH: loop header
LB: loop body
LE: loop exit
PB: predicated region body
PF: predicated region fallthrough
CT: control target
= control target key end

     0   :  { %s2699_s0 = inlined_call_operand.vmem [shape: f32[2,10,32], index: 0, kind: input, shape index: {}]   ;;  %s2700_s1 = inlined_call_operand.vmem [shape: f32[2,2,64], index: 1, kind: input, shape index: {}]   ;;  %s2701_s2 = inlined_call_operand.vmem [shape: bf16[2,32,96], index: 2, kind: input, shape index: {}]   ;;  %s2702_s3 = inlined_call_operand.vmem [shape: bf16[2,32,32], index: 3, kind: input, shape index: {}]   ;;  %s2703_s4 = inlined_call_operand.vmem [shape: bf16[2,32,32], index: 4, kind: input, shape index: {}]   ;;  %s2704_s5 = inlined_call_operand.vmem [shape: bf16[2,32,32], index: 5, kind: input, shape index: {}]   ;;  %s2705_s6 = inlined_call_operand.vmem [shape: bf16[2,32,128], index: 6, kind: input, shape index: {}]   ;;  %s2706_s7 = inlined_call_operand.vmem [shape: bf16[2,64,32], index: 7, kind: input, shape index: {}]   ;;  %s2707_s8 = inlined_call_operand.vmem [shape: bf16[2,8,128], index: 8, kind: input, shape index: {}]   ;;  %s2708_s9 = inlined_call_operand.vmem [shape: bf16[2,16,128], index: 9, kind: input, shape index: {}]   ;;  %s2709_s10 = inlined_call_operand.vmem [shape: f32[2,32], index: 10, kind: input, shape index: {}]   ;;  %s2710_s11 = inlined_call_operand.vmem [shape: f32[16,8], index: 11, kind: input, shape index: {}]   ;;  %s2711_s12 = inlined_call_operand.vmem [shape: f32[16,1], index: 12, kind: input, shape index: {}]   ;;  %s2712_s13 = inlined_call_operand.vmem [shape: f32[8,8], index: 13, kind: input, shape index: {}]   ;;  %s2713_s14 = inlined_call_operand.vmem [shape: bf16[64,8], index: 14, kind: input, shape index: {}]   ;;  %s2714_s15 = inlined_call_operand.vmem [shape: f32[8,64], index: 15, kind: input, shape index: {}]   ;;  %s2715_s16 = inlined_call_operand.vmem [shape: f32[2,32], index: 16, kind: input, shape index: {}]   ;;  %s2716_s17 = inlined_call_operand.vmem [shape: bf16[32,128], index: 17, kind: input, shape index: {}]   ;;  %s2717_s18 = inlined_call_operand.vmem [shape: bf16[2,1,128], index: 18, kind: output, shape index: {0}]   ;;  %s2718_s19 = inlined_call_operand.vmem [shape: f32[1,128], index: 19, kind: output, shape index: {1}]  }
   0x1   :  { %2724 = sst [smem:[#allocation4_spill]] %s2699_s0  ;;  %s2415_s0 = smov 0  }
   0x2   :  { %2725 = sst [smem:[#allocation5_spill]] %s2700_s1 }
   0x3   :  { %2726 = sst [smem:[#allocation6_spill]] %s2701_s2 }
   0x4   :  { %2727 = sst [smem:[#allocation7_spill]] %s2702_s3 }
   0x5   :  { %2728 = sst [smem:[#allocation8_spill]] %s2703_s4 }
   0x6   :  { %2729 = sst [smem:[#allocation9_spill]] %s2704_s5 }
   0x7   :  { %2730 = sst [smem:[#allocation10_spill]] %s2710_s11 }
   0x8   :  { %2731 = sst [smem:[#allocation11_spill]] %s2712_s13 }
   0x9   :  { %2732 = sst [smem:[#allocation12_spill]] %s2713_s14 }
   0xa   :  { %2733 = sst [smem:[#allocation13_spill]] %s2714_s15 }
   0xb   :  { %2734 = sst [smem:[#allocation14_spill]] %s2715_s16 }
   0xc   :  { %2735 = sst [smem:[#allocation15_spill]] %s2716_s17 }
   0xd   :  { %2736 = sst [smem:[#allocation16_spill]] %s2718_s19 }
   0xe LB: > { %2737 = sst [smem:[#allocation3_spill]] %s2305_s0  ;;  %s2421_s30 = sadd.s32 4294967295, %s2305_s0   ;;  %s2305_s0 = sphi %s2415_s0, %s30_s0  }
   0xf   : > { %p2021_p0 = scmp.ge.s32.totalorder %s2305_s0, 1  ;;  %p623_p1 = scmp.lt.s32.totalorder %s2305_s0, 3 }
  0x11   : > { %p624_p2 = pnand %p2021_p0, %p623_p1 }
  0x12   : > { %p720_p3 = scmp.lt.s32.totalorder (!%p624_p2), %s2421_s30, 1  ;;  %s2738_s23 = sld [smem:[#allocation4_spill]] (!%p624_p2) }
  0x13   : > { %627 = sbr.rel (%p624_p2) target bundleno = 5675 (0x162b), region = 92  ;;  %s2739_s26 = sld [smem:[#allocation5_spill]] (!%p624_p2) }
  0x14   : > { %s2740_s0 = sld [smem:[#allocation6_spill]] (!%p624_p2)  ;;  %s2741_s13 = sld [smem:[#allocation7_spill]] (!%p624_p2) }
  0x15   : > { %s2742_s4 = sld [smem:[#allocation8_spill]] (!%p624_p2)  ;;  %s2743_s5 = sld [smem:[#allocation9_spill]] (!%p624_p2) }
  0x16   : > { %p2040_p4 = scmp.ne.s32.totalorder (!%p624_p2), %s2421_s30, 0 }
  0x1a   : > { %s721_s20 = scalar_select %p720_p3, %s2421_s30, 1 }
  0x1b   : > { %v778_v0 = vld [vmem:[%s2709_s10] sm:$0x3] (!%p2040_p4)  ;;  %vm779_vm0 = vcmask (!%p2040_p4), 254976  }
  0x1c   : > { %s2092_s21 = sshll.u32 %s721_s20, 4  ;;  %s2024_s1 = sshll.u32 %s721_s20, 1  ;;  %780 = vst.msk [vmem:[#allocation2] sm:$0x3] (!%p2040_p4), %vm779_vm0, %v778_v0 }
  0x1d   : > { %s2430_s24 = scalar_lea.vmem %s2738_s23, %s2092_s21  ;;  %s2435_s27 = scalar_lea.vmem %s2739_s26, %s2024_s1 }
  0x1e   : > { %s2440_s19 = scalar_lea.vmem %s2740_s0, %s2092_s21  ;;  %s2445_s15 = scalar_lea.vmem %s2741_s13, %s2092_s21 }
  0x1f   : > { %s2450_s22 = scalar_lea.vmem %s2742_s4, %s2092_s21  ;;  %s2455_s1 = scalar_lea.vmem %s2743_s5, %s2092_s21 }
  0x20   : > { %s2460_s0 = scalar_lea.vmem %s2705_s6, %s2092_s21  ;;  %s2098_s26 = sshll.u32 %s721_s20, 5 }
  0x21   : > { %s2465_s13 = scalar_lea.vmem %s2706_s7, %s2098_s26  ;;  %s2037_s17 = sshll.u32 %s721_s20, 2 }
  0x22   : > { %s2470_s29 = scalar_lea.vmem %s2707_s8, %s2037_s17  ;;  %s2099_s2 = sshll.u32 %s721_s20, 3 }
  0x23   : > { %s2475_s5 = scalar_lea.vmem %s2708_s9, %s2099_s2  ;;  %s2480_s3 = scalar_lea.vmem %s2717_s18, %s721_s20 }
  0x24   : > { %777 = sbr.rel (%p2040_p4) target bundleno = 43 (0x2b), region = 96 }
  0x2b PF: > { %v2486_v1 = vld [vmem:[#allocation2] sm:$0x3]  ;;  %vm793_vm1 = vcmask 254976   ;;  %v2307_v9 = vmov 0.0   ;;  %vm2308_vm2 = vmmov 0   ;;  %v2252_v10 = vld [vmem:[%s2440_s19 + $0x8] sm:$0xff]   ;;  %v933_v45 = vlaneseq }
  0x2c   : > { %v794_v2 = vsel %vm793_vm1, %v2486_v1, 0.0  ;;  %v2251_v8 = vld [vmem:[%s2440_s19] sm:$0xff]   ;;  %2137 = vmatprep.subr.bf16.mxu0 %v2307_v9  ;;  %2141 = vmatprep.mubr.msk.bf16.mxu0 %vm2308_vm2, %v2307_v9  ;;  %vm835_vm3 = vcmask 261120   ;;  %v2309_v21 = vmov 0   ;;  %v916_v25 = vld [vmem:[%s2711_s12 + $0x8] sm:$0xff]  ;;  %s2310_s17 = smov 64  }
  0x2d   : > { %795 = vadd.xlane.f32.xlu0 %v794_v2  ;;  %2138 = vmatpush3.bf16.msra.mxu0 %v2251_v8  ;;  %v2041_v15 = vld [vmem:[%s2430_s24] ss:$0 sm:$0xff]  ;;  %v2042_v17 = vld [vmem:[%s2430_s24 + $0x1] ss:$0 sm:$0xff]  ;;  %vm918_vm5 = vcmp.ne.f32.partialorder %v916_v25, 0.0  ;;  %s2311_s11 = smov 96  }
  0x2e   : > { %2145 = vmatprep.subr.bf16.mxu1 %v2307_v9  ;;  %2139 = vmatprep.subr.bf16.mxu0 %v2307_v9  ;;  %v915_v22 = vld [vmem:[%s2711_s12] sm:$0xff]  ;;  %v922_v30 = vsel %vm918_vm5, 1, %v2309_v21  ;;  %s2312_s14 = smov 32   ;;  %s2744_s21 = sld [smem:[#allocation12_spill]]  ;;  %vm909_vm10 = vcmask 1040384   ;;  %v934_v48 = vshrl.u32 %v933_v45, 7 }
  0x2f   : > { %2153 = vmatprep.mubr.msk.bf16.mxu1 %vm2308_vm2, %v2307_v9  ;;  %2250 = vset.pattern.permute.xlu1 %v2309_v21  ;;  %vm917_vm4 = vcmp.ne.f32.partialorder %v915_v22, 0.0  ;;  %vm910_vm11 = vsmask.f32 256  ;;  %vm904_vm12 = vcmask 523264   ;;  %v912_v52 = vld [vmem:[%s2480_s3] sm:$0x1] }
  0x30   : > { %2249 = vset.pattern.permute.xlu0 %v2309_v21  ;;  %v921_v23 = vsel %vm917_vm4, 1, %v2309_v21  ;;  %vm911_vm13 = vmand %vm909_vm10, %vm910_vm11  ;;  %v2551_v56 = vsub.s32 0, %v934_v48  ;;  %v2257_v60 = vld [vmem:[%s2475_s5] sm:$0xff]   ;;  %s2745_s16 = sld [smem:[#allocation10_spill]]  ;;  %vm1030_vm15 = vcmask 64512   ;;  %vm1079_vm0 = vcmask 130048  }
  0x31   : > { %2140 = vmatpush3.bf16.msra.mxu0 %v2252_v10  ;;  %v2258_v45 = vld [vmem:[%s2445_s15] sm:$0xff]   ;;  %s2746_s28 = sld [smem:[#allocation13_spill]]  ;;  %vm1413_vm4 = vcmask 1043456   ;;  %p2084_p5 = scmp.ne.s32.totalorder %s2421_s30, 1 }
  0x32   : > { %2157 = vmatprep.subr.bf16.mxu0 %v2307_v9  ;;  %vm2314_vm5 = vmmov (!%p2084_p5), 0   ;;  %s2750_s5 = sld [smem:[#allocation16_spill]] (!%p2084_p5) }
  0x34   : > { %v2520_v31 = vld [vmem:[%s2744_s21] sm:$0xff]   ;;  %v2526_v32 = vld [vmem:[%s2744_s21 + $0x8] sm:$0xff]   ;;  %v2534_v33 = vld [vmem:[%s2744_s21 + $0x10] sm:$0xff]  }
  0x35   : > { %2146 = vmatpush3.bf16.msra.mxu1 %v2520_v31  ;;  %v2541_v34 = vld [vmem:[%s2744_s21 + $0x18] sm:$0xff]  }
  0x36   : > { %2147 = vmatprep.subr.bf16.mxu1 %v2307_v9 }
  0x39   : > { %2148 = vmatpush3.bf16.msra.mxu1 %v2526_v32 }
  0x3a   : > { %2149 = vmatprep.subr.bf16.mxu1 %v2307_v9 }
  0x3d   : > { %2150 = vmatpush3.bf16.msra.mxu1 %v2534_v33 }
  0x3e   : > { %2151 = vmatprep.subr.bf16.mxu1 %v2307_v9 }
  0x41   : > { %2152 = vmatpush3.bf16.msra.mxu1 %v2541_v34 }
  0x42   : > { %2171 = vmatprep.subr.bf16.mxu1 %v2307_v9 }
  0xba   : > { %v796_v3 = vpop.xlane.xlu0 %795 }
  0xbb   : > { %v798_v4 = vmul.f32 0.03125, %v796_v3  ;;  %v952_v3 = vld [vmem:[%s2745_s16] sm:$0xff] }
  0xbd   : > { %v799_v5 = vsub.f32 %v2486_v1, %v798_v4 }
  0xbf   : > { %v800_v6 = vmul.f32 %v799_v5, %v799_v5 }
  0xc1   : > { %v801_v7 = vsel %vm793_vm1, %v800_v6, 0.0 }
  0xc2   : > { %802 = vadd.xlane.f32.xlu0 %v801_v7 }
  0xd8   : > { %924 = vperm.xlu0 %2249, %v921_v23  }
 0x14f   : > { %v803_v11 = vpop.xlane.xlu0 %802 }
 0x150   : > { %v804_v12 = vmul.f32 0.03125, %v803_v11 }
 0x152   : > { %v805_v13 = vadd.f32 1e-05, %v804_v12 }
 0x154   : > { %2271 = vrsqrt.f32 %v805_v13 }
 0x157   : > { %v925_v42 = vpop.permute.xlu0 %924 }
 0x158   : > { %vm929_vm6 = vcmp.eq.s32.totalorder %v925_v42, 1 }
 0x159   : > { %vm937_vm8 = vmpackc.low %vm929_vm6, %vm929_vm6 }
 0x15a   : > { %v939_v50 = vsel %vm937_vm8, 65537, %v2309_v21 }
 0x15e   : > { %v2272_v14 = vpop.eup %2271 }
 0x15f   : > { %v807_v16 = vmul.f32 %v2272_v14, %v799_v5  ;;  %v953_v5 = vld [vmem:[%s2745_s16 + $0x8] sm:$0xff] }
 0x161   : > { %v812_v18 = vmul.f32 %v2041_v15, %v807_v16 }
 0x163   : > { %v817_v19 = vadd.f32 %v2042_v17, %v812_v18 }
 0x165   : > { %v818_v20 = vpack.c.bf16 %v817_v19, %v817_v19 }
 0x167   : > { %2142 = vmatmul.mubr.msk.bf16.vlgmr.msra.gmra.mrb[0].mxu0 %vm835_vm3, %v818_v20 }
 0x168   : > { %2159 = vmatprep.mubr.msk.bf16.mxu0 %vm2308_vm2, %v2307_v9 }
 0x23a   : > { %v873_v24 = vpop.f32.mrb[0].mxu0 }
 0x23b   : > { %893 = vrot.lane.b32.xlu1 %v873_v24, %s2310_s17  ;;  %v2143_v26 = vpop.f32.mrb[1].mxu0  ;;  %v880_v29 = vrot.slane %v873_v24, 1 }
 0x23c   : > { %v876_v27 = vpop.f32.mrb[2].mxu0 }
 0x23d   : > { %v2144_v28 = vpop.f32.mrb[3].mxu0 }
 0x23f   : > { %896 = vrot.lane.b32.xlu1 %v880_v29, %s2311_s11 }
 0x243   : > { %927 = vperm.xlu1 %2250, %v922_v30  }
 0x247   : > { %887 = vrot.lane.b32.xlu1 %v873_v24, %s2311_s11 }
 0x24b   : > { %881 = vrot.lane.b32.xlu1 %v880_v29, %s2312_s14 }
 0x2ad   : > { %v894_v35 = vpop.permute.xlu1 %893 }
 0x2b1   : > { %v897_v36 = vpop.permute.xlu1 %896 }
 0x2b2   : > { %v899_v37 = vsel %vm835_vm3, %v894_v35, %v897_v36 }
 0x2b3   : > { %v900_v38 = vpack.c.bf16 %v899_v37, %v899_v37 }
 0x2b5   : > { %902 = vrot.lane.b32.xlu1 %v900_v38, %s2310_s17 }
 0x2c2   : > { %v928_v39 = vpop.permute.xlu1 %927 }
 0x2c3   : > { %vm930_vm7 = vcmp.eq.s32.totalorder %v928_v39, 1 }
 0x2c4   : > { %vm938_vm9 = vmpackc.low %vm930_vm7, %vm930_vm7 }
 0x2c5   : > { %v940_v49 = vsel %vm938_vm9, 65537, %v2309_v21 }
 0x2c6   : > { %v888_v40 = vpop.permute.xlu1 %887  ;;  %v2046_v55 = vcombine.low %v939_v50, %v940_v49 }
 0x2c7   : > { %v891_v46 = vsel %vm835_vm3, %v888_v40, %v880_v29 }
 0x2c8   : > { %v892_v51 = vpack.c.bf16 %v891_v46, %v891_v46  ;;  %vm944_vm14 = vcmp.ne.s16.totalorder %v2046_v55, 0  ;;  %v2259_v46 = vld [vmem:[%s2445_s15 + $0x8] sm:$0xff]  }
 0x2ca   : > { %v882_v41 = vpop.permute.xlu1 %881 }
 0x2cb   : > { %v884_v43 = vsel %vm835_vm3, %v873_v24, %v882_v41 }
 0x2cc   : > { %v885_v44 = vmul.f32 0.35355338, %v884_v43 }
 0x2ce   : > { %v886_v47 = vpack.c.bf16 %v885_v44, %v885_v44 }
 0x2d0   : > { %v955_v54 = vpack.i.b16 %v886_v47, %v886_v47  ;;  %v2582_v47 = vld [vmem:[%s2746_s28] sm:$0xff] }
 0x2d2   : > { %v960_v62 = vrot.slane %v955_v54, %v2551_v56 }
 0x327   : > { %v903_v53 = vpop.permute.xlu1 %902 }
 0x328   : > { %v907_v57 = vsel %vm904_vm12, %v892_v51, %v903_v53 }
 0x329   : > { %v913_v58 = vsel %vm911_vm13, %v907_v57, %v912_v52  ;;  %v931_v59 = vpack.i.b16 %v907_v57, %v907_v57 }
 0x32a   : > { %914 = vst [vmem:[%s2480_s3] sm:$0x1] %v913_v58 }
 0x32b   : > { %v936_v61 = vrot.slane %v931_v59, %v2551_v56 }
 0x32d   : > { %v951_v63 = vsel %vm944_vm14, %v936_v61, %v2257_v60 }
 0x32e   : > { %1076 = vrot.lane.b32.xlu1 %v951_v63, %s2310_s17  ;;  %v961_v0 = vmul.bf16 %v960_v62, %v951_v63 }
 0x330   : > { %2154 = vmatmul.mubr.msk.bf16.vlgmr.msra.gmra.mrb[0].mxu1 %vm904_vm12, %v961_v0 }
 0x331   : > { %2175 = vmatprep.mubr.msk.bf16.mxu1 %vm2308_vm2, %v2307_v9 }
 0x3a0   : > { %v1077_v2 = vpop.permute.xlu1 %1076 }
 0x3a1   : > { %2158 = vmatpush3.bf16.msra.mxu0 %v1077_v2 }
 0x3a2   : > { %2163 = vmatprep.subr.bf16.mxu0 %v2307_v9 }
 0x403   : > { %v1023_v4 = vpop.f32.mrb[0].mxu1 }
 0x404   : > { %v1024_v6 = vadd.f32 %v1023_v4, %v952_v3  ;;  %v2155_v7 = vpop.f32.mrb[1].mxu1 }
 0x405   : > { %v1026_v8 = vpop.f32.mrb[2].mxu1 }
 0x406   : > { %v1027_v10 = vadd.f32 %v1026_v8, %v953_v5  ;;  %v2156_v11 = vpop.f32.mrb[3].mxu1  ;;  %v1031_v12 = vsel %vm1030_vm15, %v1024_v6, -inf }
 0x408   : > { %v1032_v13 = vsel %vm1030_vm15, %v1027_v10, -inf }
 0x409   : > { %v1033_v14 = vmax.f32 %v1031_v12, %v1032_v13  ;;  %v2057_v12 = vld [vmem:[%s2430_s24 + $0x2] ss:$0 sm:$0xff] }
 0x40b   : > { %v1034_v15 = vrot.slane %v1033_v14, 4 }
 0x40d   : > { %v1035_v16 = vmax.f32 %v1033_v14, %v1034_v15  ;;  %v2058_v14 = vld [vmem:[%s2430_s24 + $0x3] ss:$0 sm:$0xff] }
 0x40f   : > { %v1036_v17 = vrot.slane %v1035_v16, 2 }
 0x411   : > { %v1037_v18 = vmax.f32 %v1035_v16, %v1036_v17 }
 0x413   : > { %v1038_v19 = vrot.slane %v1037_v18, 1 }
 0x415   : > { %v1039_v20 = vmax.f32 %v1037_v18, %v1038_v19 }
 0x417   : > { %v1040_v21 = vsub.f32 %v1024_v6, %v1039_v20  ;;  %v1041_v22 = vsub.f32 %v1027_v10, %v1039_v20 }
 0x419   : > { %v1042_v23 = vmul.f32 1.442695, %v1040_v21  ;;  %v1044_v24 = vmul.f32 1.442695, %v1041_v22 }
 0x41b   : > { %2273 = vpow2.f32 %v1042_v23 }
 0x41c   : > { %2275 = vpow2.f32 %v1044_v24  ;;  %v2260_v24 = vld [vmem:[%s2450_s22] sm:$0xff]  }
 0x41d   : > { %2172 = vmatpush3.bf16.msra.mxu1 %v2260_v24 }
 0x41e   : > { %2173 = vmatprep.subr.bf16.mxu1 %v2307_v9 }
 0x425   : > { %v2274_v25 = vpop.eup %2273 }
 0x426   : > { %v2276_v26 = vpop.eup %2275  ;;  %v1046_v27 = vsel %vm1030_vm15, %v2274_v25, 0.0 }
 0x427   : > { %v1047_v28 = vsel %vm1030_vm15, %v2276_v26, 0.0 }
 0x428   : > { %v1048_v29 = vadd.f32 %v1047_v28, %v1046_v27 }
 0x42a   : > { %v1049_v30 = vrot.slane %v1048_v29, 4 }
 0x42c   : > { %v1050_v35 = vadd.f32 %v1049_v30, %v1048_v29  ;;  %v2059_v29 = vld [vmem:[%s2430_s24 + $0x4] ss:$0 sm:$0xff] }
 0x42e   : > { %v1051_v36 = vrot.slane %v1050_v35, 2 }
 0x430   : > { %v1052_v37 = vadd.f32 %v1051_v36, %v1050_v35  ;;  %v2060_v35 = vld [vmem:[%s2430_s24 + $0x5] ss:$0 sm:$0xff] }
 0x432   : > { %v1053_v38 = vrot.slane %v1052_v37, 1 }
 0x434   : > { %v1054_v39 = vadd.f32 %v1053_v38, %v1052_v37 }
 0x436   : > { %2277 = vrcp.f32 %v1054_v39 }
 0x440   : > { %v2278_v40 = vpop.eup %2277 }
 0x441   : > { %v1056_v41 = vmul.f32 %v2278_v40, %v2274_v25  ;;  %v1057_v42 = vmul.f32 %v2278_v40, %v2276_v26  ;;  %v2261_v25 = vld [vmem:[%s2450_s22 + $0x8] sm:$0xff]  }
 0x442   : > { %2174 = vmatpush3.bf16.msra.mxu1 %v2261_v25 }
 0x443   : > { %v1058_v43 = vpack.c.bf16 %v1057_v42, %v1056_v41  ;;  %2191 = vmatprep.subr.bf16.mxu1 %v2307_v9 }
 0x445   : > { %1059 = vxpose.xlu1.c.b16.start.end [1/1] (short) (narrow) %v1058_v43, 16 }
 0x4ab   : > { %v1067_v44 = vpop.trf.xlu1 }
 0x4ac   : > { %2160 = vmatmul.mubr.msk.bf16.vlgmr.msra.gmra.mrb[4].mxu0 %vm1079_vm0, %v1067_v44 }
 0x4ad   : > { %2167 = vmatprep.mubr.msk.bf16.mxu0 %vm2308_vm2, %v2307_v9  ;;  %2164 = vmatpush3.bf16.msra.mxu0 %v2258_v45 }
 0x4ae   : > { %2165 = vmatprep.subr.bf16.mxu0 %v2307_v9 }
 0x4b1   : > { %2166 = vmatpush3.bf16.msra.mxu0 %v2259_v46 }
 0x4b2   : > { %2179 = vmatprep.subr.bf16.mxu0 %v2307_v9 }
 0x57f   : > { %v1117_v48 = vpop.f32.mrb[4].mxu0 }
 0x580   : > { %v1123_v49 = vmul.f32 %v1117_v48, %v2582_v47  ;;  %v2161_v50 = vpop.f32.mrb[5].mxu0 }
 0x581   : > { %v1120_v51 = vpop.f32.mrb[6].mxu0  ;;  %v1316_v50 = vld [vmem:[%s2470_s29] sm:$0xf] }
 0x582   : > { %v1124_v52 = vsel %vm904_vm12, %v1123_v49, 0.0  ;;  %v2162_v53 = vpop.f32.mrb[7].mxu0 }
 0x583   : > { %v1125_v54 = vrot.slane %v1124_v52, 4  ;;  %v2065_v53 = vcombine.low %v1316_v50, %v1316_v50 }
 0x585   : > { %v1126_v55 = vadd.f32 %v1125_v54, %v1124_v52 }
 0x587   : > { %v1127_v57 = vrot.slane %v1126_v55, 2 }
 0x589   : > { %v1128_v58 = vadd.f32 %v1127_v57, %v1126_v55 }
 0x58b   : > { %v1129_v59 = vrot.slane %v1128_v58, 1 }
 0x58d   : > { %v1130_v60 = vadd.f32 %v1129_v59, %v1128_v58 }
 0x58f   : > { %1132 = vrot.lane.b32.xlu0 %v1130_v60, %s2311_s11 }
 0x601   : > { %v1133_v61 = vpop.permute.xlu0 %1132 }
 0x602   : > { %v1136_v62 = vsel %vm909_vm10, %v1130_v60, %v1133_v61 }
 0x603   : > { %v1137_v63 = vpack.c.bf16 %v1136_v62, %v1136_v62 }
 0x605   : > { %2168 = vmatmul.mubr.msk.bf16.vlgmr.msra.gmra.mrb[8].mxu0 %vm835_vm3, %v1137_v63 }
 0x606   : > { %2180 = vmatpush3.bf16.msra.mxu0 %v2520_v31  ;;  %2187 = vmatprep.mubr.msk.bf16.mxu0 %vm2308_vm2, %v2307_v9 }
 0x607   : > { %2181 = vmatprep.subr.bf16.mxu0 %v2307_v9 }
 0x60a   : > { %2182 = vmatpush3.bf16.msra.mxu0 %v2526_v32 }
 0x60b   : > { %2183 = vmatprep.subr.bf16.mxu0 %v2307_v9 }
 0x60e   : > { %2184 = vmatpush3.bf16.msra.mxu0 %v2534_v33 }
 0x60f   : > { %2185 = vmatprep.subr.bf16.mxu0 %v2307_v9 }
 0x612   : > { %2186 = vmatpush3.bf16.msra.mxu0 %v2541_v34 }
 0x613   : > { %2205 = vmatprep.subr.bf16.mxu0 %v2307_v9 }
 0x6d8   : > { %v1191_v0 = vpop.f32.mrb[8].mxu0 }
 0x6d9   : > { %v2169_v2 = vpop.f32.mrb[9].mxu0  ;;  %v1199_v31 = vsel %vm793_vm1, %v1191_v0, 0.0 }
 0x6da   : > { %1200 = vadd.xlane.f32.xlu0 %v1199_v31  ;;  %v1194_v3 = vpop.f32.mrb[10].mxu0 }
 0x6db   : > { %v2170_v4 = vpop.f32.mrb[11].mxu0 }
 0x6f0   : > { %1408 = vrot.lane.b32.xlu0 %v2065_v53, %s2310_s17 }
 0x767   : > { %v1201_v32 = vpop.xlane.xlu0 %1200 }
 0x768   : > { %v1202_v5 = vmul.f32 0.03125, %v1201_v32 }
 0x76a   : > { %v1203_v6 = vsub.f32 %v1191_v0, %v1202_v5 }
 0x76b   : > { %v1409_v32 = vpop.permute.xlu0 %1408 }
 0x76c   : > { %v1204_v7 = vmul.f32 %v1203_v6, %v1203_v6  ;;  %v1415_v5 = vsel %vm1413_vm4, %v1409_v32, 0  ;;  %v2072_v32 = vld [vmem:[%s2430_s24 + $0x8] ss:$0 sm:$0xff] }
 0x76e   : > { %v1205_v33 = vsel %vm793_vm1, %v1204_v7, 0.0 }
 0x76f   : > { %1206 = vadd.xlane.f32.xlu1 %v1205_v33 }
 0x7fc   : > { %v1207_v8 = vpop.xlane.xlu1 %1206 }
 0x7fd   : > { %v1208_v34 = vmul.f32 0.03125, %v1207_v8 }
 0x7ff   : > { %v1209_v10 = vadd.f32 1e-05, %v1208_v34 }
 0x801   : > { %2279 = vrsqrt.f32 %v1209_v10 }
 0x80b   : > { %v2280_v11 = vpop.eup %2279 }
 0x80c   : > { %v1211_v13 = vmul.f32 %v2280_v11, %v1203_v6 }
 0x80e   : > { %v1216_v15 = vmul.f32 %v2057_v12, %v1211_v13 }
 0x810   : > { %v1221_v16 = vadd.f32 %v2058_v14, %v1216_v15 }
 0x812   : > { %v2604_v17 = vadd.f32 %v1221_v16, %v2486_v1 }
 0x814   : > { %v1225_v18 = vsel %vm793_vm1, %v2604_v17, 0.0 }
 0x815   : > { %1226 = vadd.xlane.f32.xlu1 %v1225_v18  ;;  %v2263_v18 = vld [vmem:[%s2455_s1] sm:$0xff]  }
 0x8a2   : > { %v1227_v19 = vpop.xlane.xlu1 %1226 }
 0x8a3   : > { %v1228_v20 = vmul.f32 0.03125, %v1227_v19  ;;  %v2264_v19 = vld [vmem:[%s2455_s1 + $0x8] sm:$0xff]   ;;  %s2748_s1 = sld [smem:[#allocation15_spill]] (!%p2084_p5) }
 0x8a5   : > { %v1229_v21 = vsub.f32 %v2604_v17, %v1228_v20 }
 0x8a7   : > { %v1230_v22 = vmul.f32 %v1229_v21, %v1229_v21 }
 0x8a9   : > { %v1231_v23 = vsel %vm793_vm1, %v1230_v22, 0.0 }
 0x8aa   : > { %1232 = vadd.xlane.f32.xlu1 %v1231_v23 }
 0x937   : > { %v1233_v1 = vpop.xlane.xlu1 %1232 }
 0x938   : > { %v1234_v26 = vmul.f32 0.03125, %v1233_v1 }
 0x93a   : > { %v1235_v27 = vadd.f32 1e-05, %v1234_v26 }
 0x93c   : > { %2281 = vrsqrt.f32 %v1235_v27 }
 0x946   : > { %v2282_v28 = vpop.eup %2281 }
 0x947   : > { %v1237_v30 = vmul.f32 %v2282_v28, %v1229_v21 }
 0x949   : > { %v1242_v36 = vmul.f32 %v2059_v29, %v1237_v30 }
 0x94b   : > { %v1247_v37 = vadd.f32 %v2060_v35, %v1242_v36 }
 0x94d   : > { %v1248_v38 = vpack.c.bf16 %v1247_v37, %v1247_v37 }
 0x94f   : > { %2176 = vmatmul.mubr.msk.bf16.vlgmr.msra.gmra.mrb[4].mxu1 %vm835_vm3, %v1248_v38 }
 0x950   : > { %2193 = vmatprep.mubr.msk.bf16.mxu1 %vm2308_vm2, %v2307_v9  ;;  %2192 = vmatpush3.bf16.msra.mxu1 %v1415_v5 }
 0x951   : > { %2197 = vmatprep.subr.bf16.mxu1 %v2307_v9 }
 0xa22   : > { %v1302_v39 = vpop.f32.mrb[4].mxu1 }
 0xa23   : > { %v1309_v40 = vrot.slane %v1302_v39, 1  ;;  %v2177_v41 = vpop.f32.mrb[5].mxu1 }
 0xa24   : > { %v1305_v42 = vpop.f32.mrb[6].mxu1 }
 0xa25   : > { %1310 = vrot.lane.b32.xlu1 %v1309_v40, %s2312_s14  ;;  %v2178_v43 = vpop.f32.mrb[7].mxu1  ;;  %s2747_s14 = sld [smem:[#allocation11_spill]] }
 0xa2b   : > { %v1317_v54 = vld [vmem:[%s2747_s14] sm:$0xff] }
 0xa97   : > { %v1311_v44 = vpop.permute.xlu1 %1310 }
 0xa98   : > { %v1313_v45 = vsel %vm835_vm3, %v1302_v39, %v1311_v44 }
 0xa99   : > { %v1314_v46 = vmul.f32 0.35355338, %v1313_v45 }
 0xa9b   : > { %v1315_v48 = vpack.c.bf16 %v1314_v46, %v1314_v46 }
 0xa9d   : > { %v1319_v49 = vpack.i.b16 %v1315_v48, %v1315_v48 }
 0xa9f   : > { %v1324_v51 = vrot.slane %v1319_v49, %v2551_v56 }
 0xaa1   : > { %v1325_v52 = vmul.bf16 %v1324_v51, %v1316_v50 }
 0xaa3   : > { %2188 = vmatmul.mubr.msk.bf16.vlgmr.msra.gmra.mrb[12].mxu0 %vm904_vm12, %v1325_v52  ;;  %v2070_v52 = vld [vmem:[%s2430_s24 + $0x6] ss:$0 sm:$0xff] }
 0xaa4   : > { %2209 = vmatprep.mubr.msk.bf16.mxu0 %vm2308_vm2, %v2307_v9 }
 0xb76   : > { %v1363_v55 = vpop.f32.mrb[12].mxu0 }
 0xb77   : > { %v1364_v57 = vadd.f32 %v1363_v55, %v1317_v54  ;;  %v2189_v58 = vpop.f32.mrb[13].mxu0  ;;  %v2071_v54 = vld [vmem:[%s2430_s24 + $0x7] ss:$0 sm:$0xff] }
 0xb78   : > { %v1366_v59 = vpop.f32.mrb[14].mxu0 }
 0xb79   : > { %v1369_v60 = vsel %vm1030_vm15, %v1364_v57, -inf  ;;  %v2190_v56 = vpop.f32.mrb[15].mxu0 }
 0xb7a   : > { %v1370_v61 = vrot.slane %v1369_v60, 4 }
 0xb7c   : > { %v1371_v62 = vmax.f32 %v1369_v60, %v1370_v61 }
 0xb7e   : > { %v1372_v63 = vrot.slane %v1371_v62, 2 }
 0xb80   : > { %v1373_v0 = vmax.f32 %v1371_v62, %v1372_v63 }
 0xb82   : > { %v1374_v2 = vrot.slane %v1373_v0, 1 }
 0xb84   : > { %v1375_v31 = vmax.f32 %v1373_v0, %v1374_v2  ;;  %v2265_v0 = vld [vmem:[%s2460_s0] sm:$0xff]   ;;  %v2266_v2 = vld [vmem:[%s2460_s0 + $0x8] sm:$0xff]  }
 0xb85   : > { %2206 = vmatpush3.bf16.msra.mxu0 %v2265_v0 }
 0xb86   : > { %v1376_v3 = vsub.f32 %v1364_v57, %v1375_v31  ;;  %2207 = vmatprep.subr.bf16.mxu0 %v2307_v9 }
 0xb88   : > { %v1377_v4 = vmul.f32 1.442695, %v1376_v3 }
 0xb89   : > { %2208 = vmatpush3.bf16.msra.mxu0 %v2266_v2 }
 0xb8a   : > { %2283 = vpow2.f32 %v1377_v4 }
 0xb94   : > { %v2284_v6 = vpop.eup %2283 }
 0xb95   : > { %v1379_v7 = vsel %vm1030_vm15, %v2284_v6, 0.0 }
 0xb96   : > { %v1380_v33 = vrot.slane %v1379_v7, 4 }
 0xb98   : > { %v1381_v8 = vadd.f32 %v1380_v33, %v1379_v7 }
 0xb9a   : > { %v1382_v34 = vrot.slane %v1381_v8, 2 }
 0xb9c   : > { %v1383_v10 = vadd.f32 %v1382_v34, %v1381_v8 }
 0xb9e   : > { %v1384_v11 = vrot.slane %v1383_v10, 1 }
 0xba0   : > { %v1385_v12 = vadd.f32 %v1384_v11, %v1383_v10 }
 0xba2   : > { %2285 = vrcp.f32 %v1385_v12 }
 0xbac   : > { %v2286_v13 = vpop.eup %2285 }
 0xbad   : > { %v1387_v14 = vmul.f32 %v2286_v13, %v2284_v6  ;;  %v2073_v6 = vld [vmem:[%s2430_s24 + $0x9] ss:$0 sm:$0xff] }
 0xbaf   : > { %v1388_v15 = vpack.c.bf16 %v1387_v14, %v1387_v14 }
 0xbb1   : > { %1389 = vxpose.xlu1.c.b16.start.end [1/1] (short) (narrow) %v1388_v15, 16 }
 0xc17   : > { %v1397_v16 = vpop.trf.xlu1 }
 0xc18   : > { %2194 = vmatmul.mubr.msk.bf16.vlgmr.msra.gmra.mrb[8].mxu1 %vm1030_vm15, %v1397_v16 }
 0xc19   : > { %2201 = vmatprep.mubr.msk.bf16.mxu1 %vm2308_vm2, %v2307_v9  ;;  %2198 = vmatpush3.bf16.msra.mxu1 %v2263_v18 }
 0xc1a   : > { %2199 = vmatprep.subr.bf16.mxu1 %v2307_v9 }
 0xc1d   : > { %2200 = vmatpush3.bf16.msra.mxu1 %v2264_v19 }
 0xc1e   : > { %2213 = vmatprep.subr.bf16.mxu1 %v2307_v9 }
 0xceb   : > { %v1451_v20 = vpop.f32.mrb[8].mxu1 }
 0xcec   : > { %v1457_v21 = vmul.f32 %v1451_v20, %v2582_v47  ;;  %v2195_v22 = vpop.f32.mrb[9].mxu1 }
 0xced   : > { %v1454_v23 = vpop.f32.mrb[10].mxu1 }
 0xcee   : > { %v1458_v24 = vsel %vm904_vm12, %v1457_v21, 0.0  ;;  %v2196_v25 = vpop.f32.mrb[11].mxu1 }
 0xcef   : > { %v1459_v1 = vrot.slane %v1458_v24, 4 }
 0xcf1   : > { %v1460_v26 = vadd.f32 %v1459_v1, %v1458_v24 }
 0xcf3   : > { %v1461_v27 = vrot.slane %v1460_v26, 2 }
 0xcf5   : > { %v1462_v28 = vadd.f32 %v1461_v27, %v1460_v26 }
 0xcf7   : > { %v1463_v29 = vrot.slane %v1462_v28, 1 }
 0xcf9   : > { %v1464_v30 = vadd.f32 %v1463_v29, %v1462_v28 }
 0xcfb   : > { %1466 = vrot.lane.b32.xlu0 %v1464_v30, %s2311_s11 }
 0xd6d   : > { %v1467_v35 = vpop.permute.xlu0 %1466 }
 0xd6e   : > { %v1469_v36 = vsel %vm909_vm10, %v1464_v30, %v1467_v35  ;;  %v2267_v30 = vld [vmem:[%s2465_s13] sm:$0xff]   ;;  %v2268_v35 = vld [vmem:[%s2465_s13 + $0x8] sm:$0xff]  }
 0xd6f   : > { %v1470_v37 = vpack.c.bf16 %v1469_v36, %v1469_v36  ;;  %v2269_v36 = vld [vmem:[%s2465_s13 + $0x10] sm:$0xff]  }
 0xd71   : > { %2202 = vmatmul.mubr.msk.bf16.vlgmr.msra.gmra.mrb[12].mxu1 %vm835_vm3, %v1470_v37  ;;  %v2270_v37 = vld [vmem:[%s2465_s13 + $0x18] sm:$0xff]  }
 0xd72   : > { %2221 = vmatprep.mubr.msk.bf16.mxu1 %vm2308_vm2, %v2307_v9  ;;  %vm1657_vm2 = vcmask 517120   ;;  %2214 = vmatpush3.bf16.msra.mxu1 %v2267_v30 }
 0xd73   : > { %2215 = vmatprep.subr.bf16.mxu1 %v2307_v9 }
 0xd76   : > { %2216 = vmatpush3.bf16.msra.mxu1 %v2268_v35 }
 0xd77   : > { %2217 = vmatprep.subr.bf16.mxu1 %v2307_v9 }
 0xd7a   : > { %2218 = vmatpush3.bf16.msra.mxu1 %v2269_v36 }
 0xd7b   : > { %2219 = vmatprep.subr.bf16.mxu1 %v2307_v9 }
 0xd7e   : > { %2220 = vmatpush3.bf16.msra.mxu1 %v2270_v37 }
 0xe44   : > { %v1524_v47 = vpop.f32.mrb[12].mxu1 }
 0xe45   : > { %v2203_v38 = vpop.f32.mrb[13].mxu1  ;;  %v1532_v39 = vsel %vm793_vm1, %v1524_v47, 0.0 }
 0xe46   : > { %1533 = vadd.xlane.f32.xlu0 %v1532_v39  ;;  %v1527_v40 = vpop.f32.mrb[14].mxu1 }
 0xe47   : > { %v2204_v41 = vpop.f32.mrb[15].mxu1 }
 0xe48   : > { %v2077_v41 = vld [vmem:[%s2435_s27] ss:$0 sm:$0xff] }
 0xed3   : > { %v1534_v42 = vpop.xlane.xlu0 %1533 }
 0xed4   : > { %v1535_v43 = vmul.f32 0.03125, %v1534_v42 }
 0xed6   : > { %v1536_v44 = vsub.f32 %v1524_v47, %v1535_v43  ;;  %v2078_v43 = vld [vmem:[%s2435_s27 + $0x1] ss:$0 sm:$0xff] }
 0xed8   : > { %v1537_v45 = vmul.f32 %v1536_v44, %v1536_v44 }
 0xeda   : > { %v1538_v46 = vsel %vm793_vm1, %v1537_v45, 0.0 }
 0xedb   : > { %1539 = vadd.xlane.f32.xlu1 %v1538_v46 }
 0xf68   : > { %v1540_v48 = vpop.xlane.xlu1 %1539 }
 0xf69   : > { %v1541_v49 = vmul.f32 0.03125, %v1540_v48 }
 0xf6b   : > { %v1542_v50 = vadd.f32 1e-05, %v1541_v49 }
 0xf6d   : > { %2287 = vrsqrt.f32 %v1542_v50 }
 0xf77   : > { %v2288_v51 = vpop.eup %2287 }
 0xf78   : > { %v1544_v53 = vmul.f32 %v2288_v51, %v1536_v44 }
 0xf7a   : > { %v1549_v55 = vmul.f32 %v2070_v52, %v1544_v53 }
 0xf7c   : > { %v1554_v57 = vadd.f32 %v2071_v54, %v1549_v55 }
 0xf7e   : > { %v2652_v58 = vadd.f32 %v1554_v57, %v2604_v17 }
 0xf80   : > { %v1558_v59 = vsel %vm793_vm1, %v2652_v58, 0.0 }
 0xf81   : > { %1559 = vadd.xlane.f32.xlu0 %v1558_v59 }
0x100e   : > { %v1560_v60 = vpop.xlane.xlu0 %1559 }
0x100f   : > { %v1561_v56 = vmul.f32 0.03125, %v1560_v60  ;;  %v2313_v60 = vmov (!%p2084_p5), 0.0  }
0x1010   : > { %2225 = vmatprep.subr.bf16.mxu0 (!%p2084_p5), %v2313_v60 }
0x1011   : > { %v1562_v61 = vsub.f32 %v2652_v58, %v1561_v56  ;;  %v2296_v56 = vld [vmem:[%s2748_s1 + $0x8] sm:$0xff] (!%p2084_p5)  }
0x1013   : > { %v1563_v62 = vmul.f32 %v1562_v61, %v1562_v61 }
0x1015   : > { %v1564_v63 = vsel %vm793_vm1, %v1563_v62, 0.0 }
0x1016   : > { %1565 = vadd.xlane.f32.xlu0 %v1564_v63 }
0x10a3   : > { %v1566_v17 = vpop.xlane.xlu0 %1565 }
0x10a4   : > { %v1567_v31 = vmul.f32 0.03125, %v1566_v17 }
0x10a6   : > { %v1568_v3 = vadd.f32 1e-05, %v1567_v31 }
0x10a8   : > { %2289 = vrsqrt.f32 %v1568_v3 }
0x10b2   : > { %v2290_v4 = vpop.eup %2289 }
0x10b3   : > { %v1570_v5 = vmul.f32 %v2290_v4, %v1562_v61 }
0x10b5   : > { %v1575_v7 = vmul.f32 %v2072_v32, %v1570_v5 }
0x10b7   : > { %v1580_v33 = vadd.f32 %v2073_v6, %v1575_v7 }
0x10b9   : > { %v1581_v8 = vpack.c.bf16 %v1580_v33, %v1580_v33 }
0x10bb   : > { %2210 = vmatmul.mubr.msk.bf16.vlgmr.msra.gmra.mrb[16].mxu0 %vm835_vm3, %v1581_v8 }
0x10bc   : > { %2229 = vmatprep.mubr.msk.bf16.mxu0 (!%p2084_p5), %vm2314_vm5, %v2313_v60 }
0x118e   : > { %v1635_v34 = vpop.f32.mrb[16].mxu0 }
0x118f   : > { %1651 = vrot.lane.b32.xlu1 %v1635_v34, %s2310_s17  ;;  %v2211_v10 = vpop.f32.mrb[17].mxu0  ;;  %v1641_v13 = vmul.f32 %v1635_v34, %v1635_v34  ;;  %s2749_s17 = sld [smem:[#allocation14_spill]] (!%p2084_p5) }
0x1190   : > { %v1638_v11 = vpop.f32.mrb[18].mxu0 }
0x1191   : > { %v2212_v12 = vpop.f32.mrb[19].mxu0  ;;  %v1642_v14 = vmul.f32 %v1641_v13, %v1635_v34 }
0x1193   : > { %v1643_v15 = vmul.f32 0.044715, %v1642_v14 }
0x1195   : > { %v1644_v16 = vadd.f32 %v1643_v15, %v1635_v34  ;;  %v2085_v2 = vld [vmem:[%s2749_s17] ss:$0 sm:$0xff] (!%p2084_p5)  ;;  %v2086_v31 = vld [vmem:[%s2749_s17 + $0x1] ss:$0 sm:$0xff] (!%p2084_p5) }
0x1197   : > { %v1645_v18 = vmul.f32 0.7978846, %v1644_v16 }
0x1199   : > { %2291 = vtanh.f32 %v1645_v18 }
0x11a3   : > { %v2292_v19 = vpop.eup %2291 }
0x11a4   : > { %v1647_v20 = vadd.f32 1.0, %v2292_v19 }
0x11a6   : > { %v1648_v21 = vmul.f32 0.5, %v1647_v20 }
0x11a8   : > { %v1649_v22 = vmul.f32 %v1648_v21, %v1635_v34 }
0x1201   : > { %v1652_v23 = vpop.permute.xlu1 %1651 }
0x1202   : > { %v1654_v24 = vmul.f32 %v1652_v23, %v1649_v22 }
0x1204   : > { %v1658_v25 = vsel %vm1657_vm2, %v1654_v24, 0.0 }
0x1205   : > { %1659 = vadd.xlane.f32.xlu0 %v1658_v25 }
0x1292   : > { %v1660_v1 = vpop.xlane.xlu0 %1659 }
0x1293   : > { %v1662_v26 = vmul.f32 0.015625, %v1660_v1 }
0x1295   : > { %v1663_v27 = vsub.f32 %v1654_v24, %v1662_v26 }
0x1297   : > { %v1664_v28 = vmul.f32 %v1663_v27, %v1663_v27 }
0x1299   : > { %v1665_v29 = vsel %vm1657_vm2, %v1664_v28, 0.0 }
0x129a   : > { %1666 = vadd.xlane.f32.xlu0 %v1665_v29 }
0x1327   : > { %v1667_v47 = vpop.xlane.xlu0 %1666 }
0x1328   : > { %v1668_v38 = vmul.f32 0.015625, %v1667_v47 }
0x132a   : > { %v1669_v39 = vadd.f32 1e-05, %v1668_v38 }
0x132c   : > { %2293 = vrsqrt.f32 %v1669_v39 }
0x1336   : > { %v2294_v40 = vpop.eup %2293 }
0x1337   : > { %v1671_v42 = vmul.f32 %v2294_v40, %v1663_v27 }
0x1339   : > { %v1676_v44 = vmul.f32 %v2077_v41, %v1671_v42 }
0x133b   : > { %v1681_v45 = vadd.f32 %v2078_v43, %v1676_v44 }
0x133d   : > { %v1682_v46 = vpack.c.bf16 %v1681_v45, %v1681_v45 }
0x133f   : > { %2222 = vmatmul.mubr.msk.bf16.vlgmr.msra.gmra.mrb[16].mxu1 %vm904_vm12, %v1682_v46 }
0x140f   : > { %1763 = sbr.rel (%p2084_p5) target bundleno = 5675 (0x162b), region = 100 }
0x1412   : > { %v1752_v48 = vpop.f32.mrb[16].mxu1 }
0x1413   : > { %v1758_v49 = vadd.f32 %v1752_v48, %v2652_v58  ;;  %v2223_v50 = vpop.f32.mrb[17].mxu1  ;;  %v2295_v58 = vld [vmem:[%s2748_s1] sm:$0xff] (!%p2084_p5)  }
0x1414   : > { %v1755_v9 = vpop.f32.mrb[18].mxu1  ;;  %2226 = vmatpush3.bf16.msra.mxu0 (!%p2084_p5), %v2295_v58 }
0x1415   : > { %1759 = vst.msk [vmem:[#allocation2] sm:$0x3] %vm793_vm1, %v1758_v49  ;;  %v2224_v51 = vpop.f32.mrb[19].mxu1  ;;  %v1766_v52 = vsel (!%p2084_p5), %vm793_vm1, %v1758_v49, 0.0  ;;  %2227 = vmatprep.subr.bf16.mxu0 (!%p2084_p5), %v2313_v60 }
0x1416   : > { %1767 = vadd.xlane.f32.xlu0 %v1766_v52 }
0x1418   : > { %2228 = vmatpush3.bf16.msra.mxu0 %v2296_v56 }
0x14a3   : > { %v1768_v53 = vpop.xlane.xlu0 %1767 }
0x14a4   : > { %v1769_v54 = vmul.f32 0.03125, %v1768_v53 }
0x14a6   : > { %v1770_v55 = vsub.f32 %v1758_v49, %v1769_v54 }
0x14a8   : > { %v1771_v57 = vmul.f32 %v1770_v55, %v1770_v55 }
0x14aa   : > { %v1772_v59 = vsel %vm793_vm1, %v1771_v57, 0.0 }
0x14ab   : > { %1773 = vadd.xlane.f32.xlu0 %v1772_v59 }
0x1538   : > { %v1774_v61 = vpop.xlane.xlu0 %1773 }
0x1539   : > { %v1775_v62 = vmul.f32 0.03125, %v1774_v61 }
0x153b   : > { %v1776_v63 = vadd.f32 1e-05, %v1775_v62 }
0x153d   : > { %2297 = vrsqrt.f32 %v1776_v63 }
0x1547   : > { %v2298_v0 = vpop.eup %2297 }
0x1548   : > { %v1778_v17 = vmul.f32 %v2298_v0, %v1770_v55 }
0x154a   : > { %v1783_v3 = vmul.f32 %v2085_v2, %v1778_v17 }
0x154c   : > { %v1788_v4 = vadd.f32 %v2086_v31, %v1783_v3 }
0x154e   : > { %v1789_v32 = vpack.c.bf16 %v1788_v4, %v1788_v4 }
0x1550   : > { %2230 = vmatmul.mubr.msk.bf16.vlgmr.msra.gmra.mrb[0].mxu0 %vm835_vm3, %v1789_v32 }
0x1623   : > { %v1843_v5 = vpop.f32.mrb[0].mxu0 }
0x1624   : > { %v1850_v6 = vmul.f32 10.0, %v1843_v5  ;;  %v2231_v7 = vpop.f32.mrb[1].mxu0  ;;  %v1849_v8 = vmul.f32 -9.0, %v1843_v5 }
0x1625   : > { %v1846_v33 = vpop.f32.mrb[2].mxu0 }
0x1626   : > { %v1852_v34 = vrot.slane %v1850_v6, 1  ;;  %v2232_v10 = vpop.f32.mrb[3].mxu0 }
0x1628   : > { %v1854_v11 = vadd.f32 %v1852_v34, %v1849_v8 }
0x162a   : > { %1855 = vst [vmem:[%s2750_s5] sm:$0x1] %v1854_v11 }
0x162b PF: > { %s2751_s3 = sld [smem:[#allocation3_spill]] }
0x1631   : > { %s30_s0 = sadd.s32 1, %s2751_s3  }
0x1632   : > { %p27_p6 = scmp.ge.s32.totalorder %s30_s0, 4  }
0x1634   :  { %29 = sbr.rel (!%p27_p6) target bundleno = 14 (0xe), region = 165 }

</bundles_post_ra>
